<compile_context>
chip_gen: v6e
topology: v6e:2x2x1
jax: 0.10.0
libtpu: 0.0.40
codegen_flags: <defaults>
</compile_context>

<pallas_src>
import jax
import jax.numpy as jnp
from jax.experimental import pallas as pl
from jax.experimental.pallas import tpu as pltpu

EPS = 1e-5


def _round_up(x, m):
    return ((x + m - 1) // m) * m


# ----------------------------- Pallas kernels -----------------------------

def _maxpool_kernel(x_ref, o_ref):
    # x_ref: (tm, 2, Wo, 2*C)  -- row-major view of 2x2 pooling windows
    # o_ref: (tm, Wo, C)
    c = o_ref.shape[-1]
    x = x_ref[...]
    m = jnp.maximum(x[:, 0], x[:, 1])                 # max over the 2 rows
    o_ref[...] = jnp.maximum(m[..., :c], m[..., c:]).astype(o_ref.dtype)


def _conv_bn_prelu_kernel(p_ref, w_ref, scale_ref, bias_ref, alpha_ref, o_ref):
    # p_ref:     (tm, Kp)       im2col patches tile (taps folded into K)
    # w_ref:     (Kp, Coutp)    flattened conv weights
    # scale/bias/alpha: (1, Coutp)
    acc = jnp.dot(p_ref[...], w_ref[...], preferred_element_type=jnp.float32)
    y = acc * scale_ref[...] + bias_ref[...]          # conv-bias + eval BN
    o_ref[...] = jnp.where(y > 0.0, y, alpha_ref[...] * y).astype(o_ref.dtype)


# ----------------------------- Wrappers (glue) -----------------------------

def maxpool2x2(x_nhwc, *, tm=256):
    # x: (N, H, W, C) -> (N, H//2, W//2, C). Reads x once from HBM.
    n, h, w, c = x_nhwc.shape
    ho, wo = h // 2, w // 2
    x = x_nhwc[:, :2 * ho, :2 * wo, :]      # PyTorch MaxPool2d(2) floors odd dims
    x4 = x.reshape(n * ho, 2, wo, 2 * c)    # pure row-major reshape (free)

    m = n * ho
    tm = min(tm, m)
    m_pad = _round_up(m, tm)
    if m_pad != m:
        x4 = jnp.pad(x4, ((0, m_pad - m), (0, 0), (0, 0), (0, 0)))

    out = pl.pallas_call(
        _maxpool_kernel,
        out_shape=jax.ShapeDtypeStruct((m_pad, wo, c), x.dtype),
        grid=(m_pad // tm,),
        in_specs=[pl.BlockSpec((tm, 2, wo, 2 * c), lambda i: (i, 0, 0, 0))],
        out_specs=pl.BlockSpec((tm, wo, c), lambda i: (i, 0, 0)),
        compiler_params=pltpu.CompilerParams(
            dimension_semantics=("parallel",)),
    )(x4)
    return out[:m].reshape(n, ho, wo, c)


def conv_bn_prelu(x_nhwc, w_hwio, conv_b, gamma, beta, mean, var, alpha,
                  *, pad, dil, tm=512):
    n, h, w, cin = x_nhwc.shape
    kh, kw, _, cout = w_hwio.shape
    out_h = h + 2 * pad - dil * (kh - 1)
    out_w = w + 2 * pad - dil * (kw - 1)
    k_dim = kh * kw * cin

    # im2col in (M, KK*Cin) layout: taps concatenated along the channel axis so
    # the whole conv collapses into a single MXU matmul per tile.
    # TODO(synk): replace HBM-side im2col (KKx input duplication) with in-kernel
    # halo-tile construction via manual DMA.
    xp = jnp.pad(x_nhwc, ((0, 0), (pad, pad), (pad, pad), (0, 0)))
    cols = [xp[:, i * dil:i * dil + out_h, j * dil:j * dil + out_w, :]
            for i in range(kh) for j in range(kw)]
    patches = jnp.concatenate(cols, axis=-1).reshape(n * out_h * out_w, k_dim)
    w_flat = w_hwio.reshape(k_dim, cout)   # [(i*kw+j)*cin + c, o] ordering

    # Fold conv bias + eval-mode BatchNorm into one per-channel scale/bias.
    bn_scale = gamma / jnp.sqrt(var + EPS)
    scale = bn_scale
    bias = beta - mean * bn_scale + conv_b * bn_scale

    # Lane/sublane-friendly padding: K and Cout to multiples of 128, M to a
    # multiple of the row tile (which is a multiple of 8).
    m = n * out_h * out_w
    kp = _round_up(k_dim, 128)
    coutp = _round_up(cout, 128)
    tm = min(tm, _round_up(m, 8))
    m_pad = _round_up(m, tm)

    patches = jnp.pad(patches, ((0, m_pad - m), (0, kp - k_dim)))
    w_flat = jnp.pad(w_flat, ((0, kp - k_dim), (0, coutp - cout)))
    scale_p = jnp.pad(scale, (0, coutp - cout)).reshape(1, coutp)
    bias_p = jnp.pad(bias, (0, coutp - cout)).reshape(1, coutp)
    alpha_p = jnp.broadcast_to(alpha.astype(jnp.float32), (1, coutp))

    out2d = pl.pallas_call(
        _conv_bn_prelu_kernel,
        out_shape=jax.ShapeDtypeStruct((m_pad, coutp), x_nhwc.dtype),
        grid=(m_pad // tm,),
        in_specs=[
            pl.BlockSpec((tm, kp), lambda i: (i, 0)),       # patches tile
            pl.BlockSpec((kp, coutp), lambda i: (0, 0)),    # weights (resident)
            pl.BlockSpec((1, coutp), lambda i: (0, 0)),     # scale
            pl.BlockSpec((1, coutp), lambda i: (0, 0)),     # bias
            pl.BlockSpec((1, coutp), lambda i: (0, 0)),     # PReLU alpha
        ],
        out_specs=pl.BlockSpec((tm, coutp), lambda i: (i, 0)),
        compiler_params=pltpu.CompilerParams(
            dimension_semantics=("parallel",)),
    )(patches, w_flat, scale_p, bias_p, alpha_p)

    return out2d[:m, :cout].reshape(n, out_h, out_w, cout)


def lka_enc_forward(x_nchw, params, first=False):
    x = jnp.transpose(x_nchw, (0, 2, 3, 1))  # NCHW -> NHWC
    if not first:
        x = maxpool2x2(x)
    p = params
    # TODO(synk): fuse conv1+conv2 through a VMEM intermediate to avoid the
    # HBM round trip of the conv1 output.
    x = conv_bn_prelu(x, p['w1'], p['b1'], p['g1'], p['be1'], p['m1'], p['v1'],
                      p['a1'], pad=2, dil=1)
    x = conv_bn_prelu(x, p['w2'], p['b2'], p['g2'], p['be2'], p['m2'], p['v2'],
                      p['a2'], pad=9, dil=3)
    return jnp.transpose(x, (0, 3, 1, 2))  # NHWC -> NCHW


# ----------------------------- Reference (pure JAX) -----------------------------

def reference_forward(x_nchw, p, first=False):
    x = jnp.transpose(x_nchw, (0, 2, 3, 1))
    if not first:
        x = jax.lax.reduce_window(x, -jnp.inf, jax.lax.max,
                                  (1, 2, 2, 1), (1, 2, 2, 1), 'VALID')

    def block(x, w, b, g, be, m, v, a, pad, dil):
        y = jax.lax.conv_general_dilated(
            x, w, window_strides=(1, 1),
            padding=[(pad, pad), (pad, pad)],
            rhs_dilation=(dil, dil),
            dimension_numbers=('NHWC', 'HWIO', 'NHWC')) + b
        y = (y - m) / jnp.sqrt(v + EPS) * g + be
        return jnp.where(y > 0, y, a * y)

    x = block(x, p['w1'], p['b1'], p['g1'], p['be1'], p['m1'], p['v1'],
              p['a1'], 2, 1)
    x = block(x, p['w2'], p['b2'], p['g2'], p['be2'], p['m2'], p['v2'],
              p['a2'], 9, 3)
    return jnp.transpose(x, (0, 3, 1, 2))


# ----------------------------- Parameter init -----------------------------

def init_params(key, cin, cout):
    ks = jax.random.split(key, 12)
    f32 = jnp.float32
    return {
        # Conv2d(cin, cout, 5) stored HWIO
        'w1': 0.1 * jax.random.normal(ks[0], (5, 5, cin, cout), f32),
        'b1': 0.1 * jax.random.normal(ks[1], (cout,), f32),
        'g1': 1.0 + 0.1 * jax.random.normal(ks[2], (cout,), f32),
        'be1': 0.1 * jax.random.normal(ks[3], (cout,), f32),
        'm1': 0.05 * jax.random.normal(ks[4], (cout,), f32),
        'v1': 1.0 + jnp.abs(0.1 * jax.random.normal(ks[5], (cout,), f32)),
        'a1': jnp.array(0.25, f32),  # PReLU default init
        # Conv2d(cout, cout, 7, dilation=3) stored HWIO
        'w2': 0.05 * jax.random.normal(ks[6], (7, 7, cout, cout), f32),
        'b2': 0.1 * jax.random.normal(ks[7], (cout,), f32),
        'g2': 1.0 + 0.1 * jax.random.normal(ks[8], (cout,), f32),
        'be2': 0.1 * jax.random.normal(ks[9], (cout,), f32),
        'm2': 0.05 * jax.random.normal(ks[10], (cout,), f32),
        'v2': 1.0 + jnp.abs(0.1 * jax.random.normal(ks[11], (cout,), f32)),
        'a2': jnp.array(0.25, f32),
    }


# ----------------------------- Main -----------------------------

if __name__ == "__main__":
    key = jax.random.PRNGKey(0)
    k_x, k_p = jax.random.split(key)

    N, C_IN, C_OUT, H, W = 2, 4, 8, 16, 16
    x = jax.random.normal(k_x, (N, C_IN, H, W), jnp.float32)
    params = init_params(k_p, C_IN, C_OUT)

    fwd = jax.jit(lambda xx: lka_enc_forward(xx, params, first=False))
    out = jax.block_until_ready(fwd(x))

    ref = jax.block_until_ready(reference_forward(x, params, first=False))

    assert out.shape == (N, C_OUT, H // 2, W // 2), out.shape
    assert jnp.allclose(out, ref, rtol=1e-3, atol=1e-3), (
        float(jnp.max(jnp.abs(out - ref))))

    print("KERNEL_OK")
</pallas_src>

<mosaic_0001>
module attributes {stable_mosaic.version = 11 : i64} {
  func.func @_maxpool_kernel(%arg0: i32, %arg1: memref<16x2x8x8xf32, #tpu.memory_space<vmem>>, %arg2: memref<16x8x4xf32, #tpu.memory_space<vmem>>) attributes {dimension_semantics = [#tpu.dimension_semantics<parallel>], iteration_bounds = array<i64: 1>, scalar_prefetch = 0 : i64, scratch_operands = 0 : i64, tpu.core_type = #tpu.core_type<tc>, window_params = [{transform_indices = @transform_0, window_bounds = array<i64: 16, 2, 8, 8>}, {transform_indices = @transform_1, window_bounds = array<i64: 16, 8, 4>}]} {
    %c0 = arith.constant 0 : index
    %c0_0 = arith.constant 0 : index
    %c0_1 = arith.constant 0 : index
    %c0_2 = arith.constant 0 : index
    %0 = vector.load %arg1[%c0, %c0_0, %c0_1, %c0_2] : memref<16x2x8x8xf32, #tpu.memory_space<vmem>>, vector<16x2x8x8xf32>
    %1 = vector.extract_strided_slice %0 {offsets = [0, 0, 0, 0], sizes = [16, 1, 8, 8], strides = [1, 1, 1, 1]} : vector<16x2x8x8xf32> to vector<16x1x8x8xf32>
    %2 = vector.shape_cast %1 : vector<16x1x8x8xf32> to vector<16x8x8xf32>
    %3 = vector.extract_strided_slice %0 {offsets = [0, 1, 0, 0], sizes = [16, 1, 8, 8], strides = [1, 1, 1, 1]} : vector<16x2x8x8xf32> to vector<16x1x8x8xf32>
    %4 = vector.shape_cast %3 : vector<16x1x8x8xf32> to vector<16x8x8xf32>
    %5 = arith.maximumf %2, %4 : vector<16x8x8xf32>
    %6 = vector.extract_strided_slice %5 {offsets = [0, 0, 0], sizes = [16, 8, 4], strides = [1, 1, 1]} : vector<16x8x8xf32> to vector<16x8x4xf32>
    %7 = vector.extract_strided_slice %5 {offsets = [0, 0, 4], sizes = [16, 8, 4], strides = [1, 1, 1]} : vector<16x8x8xf32> to vector<16x8x4xf32>
    %8 = arith.maximumf %6, %7 : vector<16x8x4xf32>
    %c0_3 = arith.constant 0 : index
    %c0_4 = arith.constant 0 : index
    %c0_5 = arith.constant 0 : index
    %9 = vector.load %arg2[%c0_3, %c0_4, %c0_5] : memref<16x8x4xf32, #tpu.memory_space<vmem>>, vector<16x8x4xf32>
    tpu.vector_store %arg2[%c0_3, %c0_4, %c0_5], %8 {strides = array<i32>} : memref<16x8x4xf32, #tpu.memory_space<vmem>>, vector<16x8x4xf32>,
    return
  }
  func.func @transform_0(%arg0: i32) -> (i32, i32, i32, i32) {
    %c0_i32 = arith.constant 0 : i32
    %c0_i32_0 = arith.constant 0 : i32
    %c0_i32_1 = arith.constant 0 : i32
    %c0_i32_2 = arith.constant 0 : i32
    return %arg0, %c0_i32, %c0_i32_0, %c0_i32_1 : i32, i32, i32, i32
  }
  func.func @transform_1(%arg0: i32) -> (i32, i32, i32) {
    %c0_i32 = arith.constant 0 : i32
    %c0_i32_0 = arith.constant 0 : i32
    %c0_i32_1 = arith.constant 0 : i32
    return %arg0, %c0_i32, %c0_i32_0 : i32, i32, i32
  }
}

module attributes {stable_mosaic.version = 11 : i64} {
  func.func @_conv_bn_prelu_kernel(%arg0: i32, %arg1: memref<128x128xf32, #tpu.memory_space<vmem>>, %arg2: memref<128x128xf32, #tpu.memory_space<vmem>>, %arg3: memref<1x128xf32, #tpu.memory_space<vmem>>, %arg4: memref<1x128xf32, #tpu.memory_space<vmem>>, %arg5: memref<1x128xf32, #tpu.memory_space<vmem>>, %arg6: memref<128x128xf32, #tpu.memory_space<vmem>>) attributes {dimension_semantics = [#tpu.dimension_semantics<parallel>], iteration_bounds = array<i64: 1>, scalar_prefetch = 0 : i64, scratch_operands = 0 : i64, tpu.core_type = #tpu.core_type<tc>, window_params = [{transform_indices = @transform_0, window_bounds = array<i64: 128, 128>}, {pipeline_mode = #tpu.pipeline_mode<synchronous>, transform_indices = @transform_1, window_bounds = array<i64: 128, 128>}, {pipeline_mode = #tpu.pipeline_mode<synchronous>, transform_indices = @transform_2, window_bounds = array<i64: 1, 128>}, {pipeline_mode = #tpu.pipeline_mode<synchronous>, transform_indices = @transform_3, window_bounds = array<i64: 1, 128>}, {pipeline_mode = #tpu.pipeline_mode<synchronous>, transform_indices = @transform_4, window_bounds = array<i64: 1, 128>}, {transform_indices = @transform_5, window_bounds = array<i64: 128, 128>}]} {
    %c0 = arith.constant 0 : index
    %c0_0 = arith.constant 0 : index
    %0 = vector.load %arg1[%c0, %c0_0] : memref<128x128xf32, #tpu.memory_space<vmem>>, vector<128x128xf32>
    %c0_1 = arith.constant 0 : index
    %c0_2 = arith.constant 0 : index
    %1 = vector.load %arg2[%c0_1, %c0_2] : memref<128x128xf32, #tpu.memory_space<vmem>>, vector<128x128xf32>
    %cst = arith.constant dense<0.000000e+00> : vector<128x128xf32>
    %2 = tpu.matmul %0, %1, %cst {dimension_numbers = #tpu.dot_dimension_numbers<[1], [0], [0], [1], [0, 0, 1, 1], [], []>} : vector<128x128xf32>, vector<128x128xf32>, vector<128x128xf32> -> vector<128x128xf32>
    %c0_3 = arith.constant 0 : index
    %c0_4 = arith.constant 0 : index
    %3 = vector.load %arg3[%c0_3, %c0_4] : memref<1x128xf32, #tpu.memory_space<vmem>>, vector<1x128xf32>
    %4 = vector.broadcast %3 : vector<1x128xf32> to vector<128x128xf32>
    %5 = arith.mulf %2, %4 : vector<128x128xf32>
    %c0_5 = arith.constant 0 : index
    %c0_6 = arith.constant 0 : index
    %6 = vector.load %arg4[%c0_5, %c0_6] : memref<1x128xf32, #tpu.memory_space<vmem>>, vector<1x128xf32>
    %7 = vector.broadcast %6 : vector<1x128xf32> to vector<128x128xf32>
    %8 = arith.addf %5, %7 : vector<128x128xf32>
    %cst_7 = arith.constant 0.000000e+00 : f32
    %9 = vector.broadcast %cst_7 : f32 to vector<128x128xf32>
    %10 = arith.cmpf ogt, %8, %9 : vector<128x128xf32>
    %c0_8 = arith.constant 0 : index
    %c0_9 = arith.constant 0 : index
    %11 = vector.load %arg5[%c0_8, %c0_9] : memref<1x128xf32, #tpu.memory_space<vmem>>, vector<1x128xf32>
    %12 = vector.broadcast %11 : vector<1x128xf32> to vector<128x128xf32>
    %13 = arith.mulf %12, %8 : vector<128x128xf32>
    %14 = arith.select %10, %8, %13 : vector<128x128xi1>, vector<128x128xf32>
    %c0_10 = arith.constant 0 : index
    %c0_11 = arith.constant 0 : index
    %15 = vector.load %arg6[%c0_10, %c0_11] : memref<128x128xf32, #tpu.memory_space<vmem>>, vector<128x128xf32>
    tpu.vector_store %arg6[%c0_10, %c0_11], %14 {strides = array<i32>} : memref<128x128xf32, #tpu.memory_space<vmem>>, vector<128x128xf32>,
    return
  }
  func.func @transform_0(%arg0: i32) -> (i32, i32) {
    %c0_i32 = arith.constant 0 : i32
    %c0_i32_0 = arith.constant 0 : i32
    return %arg0, %c0_i32 : i32, i32
  }
  func.func @transform_1(%arg0: i32) -> (i32, i32) {
    %c0_i32 = arith.constant 0 : i32
    %c0_i32_0 = arith.constant 0 : i32
    %c0_i32_1 = arith.constant 0 : i32
    return %c0_i32, %c0_i32_0 : i32, i32
  }
  func.func @transform_2(%arg0: i32) -> (i32, i32) {
    %c0_i32 = arith.constant 0 : i32
    %c0_i32_0 = arith.constant 0 : i32
    %c0_i32_1 = arith.constant 0 : i32
    return %c0_i32, %c0_i32_0 : i32, i32
  }
  func.func @transform_3(%arg0: i32) -> (i32, i32) {
    %c0_i32 = arith.constant 0 : i32
    %c0_i32_0 = arith.constant 0 : i32
    %c0_i32_1 = arith.constant 0 : i32
    return %c0_i32, %c0_i32_0 : i32, i32
  }
  func.func @transform_4(%arg0: i32) -> (i32, i32) {
    %c0_i32 = arith.constant 0 : i32
    %c0_i32_0 = arith.constant 0 : i32
    %c0_i32_1 = arith.constant 0 : i32
    return %c0_i32, %c0_i32_0 : i32, i32
  }
  func.func @transform_5(%arg0: i32) -> (i32, i32) {
    %c0_i32 = arith.constant 0 : i32
    %c0_i32_0 = arith.constant 0 : i32
    return %arg0, %c0_i32 : i32, i32
  }
}

module attributes {stable_mosaic.version = 11 : i64} {
  func.func @_conv_bn_prelu_kernel(%arg0: i32, %arg1: memref<128x512xf32, #tpu.memory_space<vmem>>, %arg2: memref<512x128xf32, #tpu.memory_space<vmem>>, %arg3: memref<1x128xf32, #tpu.memory_space<vmem>>, %arg4: memref<1x128xf32, #tpu.memory_space<vmem>>, %arg5: memref<1x128xf32, #tpu.memory_space<vmem>>, %arg6: memref<128x128xf32, #tpu.memory_space<vmem>>) attributes {dimension_semantics = [#tpu.dimension_semantics<parallel>], iteration_bounds = array<i64: 1>, scalar_prefetch = 0 : i64, scratch_operands = 0 : i64, tpu.core_type = #tpu.core_type<tc>, window_params = [{transform_indices = @transform_0, window_bounds = array<i64: 128, 512>}, {pipeline_mode = #tpu.pipeline_mode<synchronous>, transform_indices = @transform_1, window_bounds = array<i64: 512, 128>}, {pipeline_mode = #tpu.pipeline_mode<synchronous>, transform_indices = @transform_2, window_bounds = array<i64: 1, 128>}, {pipeline_mode = #tpu.pipeline_mode<synchronous>, transform_indices = @transform_3, window_bounds = array<i64: 1, 128>}, {pipeline_mode = #tpu.pipeline_mode<synchronous>, transform_indices = @transform_4, window_bounds = array<i64: 1, 128>}, {transform_indices = @transform_5, window_bounds = array<i64: 128, 128>}]} {
    %c0 = arith.constant 0 : index
    %c0_0 = arith.constant 0 : index
    %0 = vector.load %arg1[%c0, %c0_0] : memref<128x512xf32, #tpu.memory_space<vmem>>, vector<128x512xf32>
    %c0_1 = arith.constant 0 : index
    %c0_2 = arith.constant 0 : index
    %1 = vector.load %arg2[%c0_1, %c0_2] : memref<512x128xf32, #tpu.memory_space<vmem>>, vector<512x128xf32>
    %cst = arith.constant dense<0.000000e+00> : vector<128x128xf32>
    %2 = tpu.matmul %0, %1, %cst {dimension_numbers = #tpu.dot_dimension_numbers<[1], [0], [0], [1], [0, 0, 1, 1], [], []>} : vector<128x512xf32>, vector<512x128xf32>, vector<128x128xf32> -> vector<128x128xf32>
    %c0_3 = arith.constant 0 : index
    %c0_4 = arith.constant 0 : index
    %3 = vector.load %arg3[%c0_3, %c0_4] : memref<1x128xf32, #tpu.memory_space<vmem>>, vector<1x128xf32>
    %4 = vector.broadcast %3 : vector<1x128xf32> to vector<128x128xf32>
    %5 = arith.mulf %2, %4 : vector<128x128xf32>
    %c0_5 = arith.constant 0 : index
    %c0_6 = arith.constant 0 : index
    %6 = vector.load %arg4[%c0_5, %c0_6] : memref<1x128xf32, #tpu.memory_space<vmem>>, vector<1x128xf32>
    %7 = vector.broadcast %6 : vector<1x128xf32> to vector<128x128xf32>
    %8 = arith.addf %5, %7 : vector<128x128xf32>
    %cst_7 = arith.constant 0.000000e+00 : f32
    %9 = vector.broadcast %cst_7 : f32 to vector<128x128xf32>
    %10 = arith.cmpf ogt, %8, %9 : vector<128x128xf32>
    %c0_8 = arith.constant 0 : index
    %c0_9 = arith.constant 0 : index
    %11 = vector.load %arg5[%c0_8, %c0_9] : memref<1x128xf32, #tpu.memory_space<vmem>>, vector<1x128xf32>
    %12 = vector.broadcast %11 : vector<1x128xf32> to vector<128x128xf32>
    %13 = arith.mulf %12, %8 : vector<128x128xf32>
    %14 = arith.select %10, %8, %13 : vector<128x128xi1>, vector<128x128xf32>
    %c0_10 = arith.constant 0 : index
    %c0_11 = arith.constant 0 : index
    %15 = vector.load %arg6[%c0_10, %c0_11] : memref<128x128xf32, #tpu.memory_space<vmem>>, vector<128x128xf32>
    tpu.vector_store %arg6[%c0_10, %c0_11], %14 {strides = array<i32>} : memref<128x128xf32, #tpu.memory_space<vmem>>, vector<128x128xf32>,
    return
  }
  func.func @transform_0(%arg0: i32) -> (i32, i32) {
    %c0_i32 = arith.constant 0 : i32
    %c0_i32_0 = arith.constant 0 : i32
    return %arg0, %c0_i32 : i32, i32
  }
  func.func @transform_1(%arg0: i32) -> (i32, i32) {
    %c0_i32 = arith.constant 0 : i32
    %c0_i32_0 = arith.constant 0 : i32
    %c0_i32_1 = arith.constant 0 : i32
    return %c0_i32, %c0_i32_0 : i32, i32
  }
  func.func @transform_2(%arg0: i32) -> (i32, i32) {
    %c0_i32 = arith.constant 0 : i32
    %c0_i32_0 = arith.constant 0 : i32
    %c0_i32_1 = arith.constant 0 : i32
    return %c0_i32, %c0_i32_0 : i32, i32
  }
  func.func @transform_3(%arg0: i32) -> (i32, i32) {
    %c0_i32 = arith.constant 0 : i32
    %c0_i32_0 = arith.constant 0 : i32
    %c0_i32_1 = arith.constant 0 : i32
    return %c0_i32, %c0_i32_0 : i32, i32
  }
  func.func @transform_4(%arg0: i32) -> (i32, i32) {
    %c0_i32 = arith.constant 0 : i32
    %c0_i32_0 = arith.constant 0 : i32
    %c0_i32_1 = arith.constant 0 : i32
    return %c0_i32, %c0_i32_0 : i32, i32
  }
  func.func @transform_5(%arg0: i32) -> (i32, i32) {
    %c0_i32 = arith.constant 0 : i32
    %c0_i32_0 = arith.constant 0 : i32
    return %arg0, %c0_i32 : i32, i32
  }
}

</mosaic_0001>

<bundles_post_ra>
// kernel: _lambda_.3
= control target key start
LH: loop header
LB: loop body
LE: loop exit
PB: predicated region body
PF: predicated region fallthrough
CT: control target
= control target key end

     0   :  { %s158_s22 = smov 124   ;;  %vm136_vm0 = vcmask 31744   ;;  %s369_s0 = inlined_call_operand.vmem [shape: f32[16,2,8,8], index: 0, kind: input, shape index: {}]   ;;  %s370_s1 = inlined_call_operand.vmem [shape: f32[16,8,4], index: 1, kind: output, shape index: {}]  }
   0x1   :  { %v12_v0 = vld [vmem:[%s369_s0 + $0x20] sm:$0xff]  ;;  %v13_v1 = vld [vmem:[%s369_s0 + $0x28] sm:$0xff]  ;;  %v14_v5 = vld [vmem:[%s369_s0 + $0x30] sm:$0xff] }
   0x2   :  { %v8_v2 = vld [vmem:[%s369_s0] sm:$0xff]  ;;  %v178_v3 = vmax.f32 %v12_v0, %v13_v1  ;;  %v9_v4 = vld [vmem:[%s369_s0 + $0x8] sm:$0xff]  ;;  %v15_v6 = vld [vmem:[%s369_s0 + $0x38] sm:$0xff] }
   0x3   :  { %v189_v7 = vmax.f32 %v8_v2, %v9_v4  ;;  %v10_v8 = vld [vmem:[%s369_s0 + $0x10] sm:$0xff]  ;;  %v11_v9 = vld [vmem:[%s369_s0 + $0x18] sm:$0xff]  ;;  %v199_v10 = vmax.f32 %v14_v5, %v15_v6  ;;  %v16_v14 = vld [vmem:[%s369_s0 + $0x40] sm:$0xff] }
   0x4   :  { %76 = vrot.lane.b32.xlu1 %v178_v3, %s158_s22  ;;  %v203_v11 = vmax.f32 %v10_v8, %v11_v9  ;;  %v18_v12 = vld [vmem:[%s369_s0 + $0x50] sm:$0xff]  ;;  %v19_v13 = vld [vmem:[%s369_s0 + $0x58] sm:$0xff]  ;;  %v17_v15 = vld [vmem:[%s369_s0 + $0x48] sm:$0xff] }
   0x5   :  { %72 = vrot.lane.b32.xlu0 %v189_v7, %s158_s22  ;;  %v219_v16 = vmax.f32 %v18_v12, %v19_v13  ;;  %v223_v17 = vmax.f32 %v16_v14, %v17_v15  ;;  %v22_v18 = vld [vmem:[%s369_s0 + $0x70] sm:$0xff]  ;;  %v23_v19 = vld [vmem:[%s369_s0 + $0x78] sm:$0xff]  ;;  %v20_v20 = vld [vmem:[%s369_s0 + $0x60] sm:$0xff] }
   0x6   :  { %v21_v21 = vld [vmem:[%s369_s0 + $0x68] sm:$0xff]  ;;  %v47_v22 = vmax.f32 %v22_v18, %v23_v19  ;;  %v26_v24 = vld [vmem:[%s369_s0 + $0x90] sm:$0xff]  ;;  %v27_v25 = vld [vmem:[%s369_s0 + $0x98] sm:$0xff] }
   0x7   :  { %v46_v23 = vmax.f32 %v20_v20, %v21_v21  ;;  %v24_v26 = vld [vmem:[%s369_s0 + $0x80] sm:$0xff]  ;;  %v25_v27 = vld [vmem:[%s369_s0 + $0x88] sm:$0xff]  ;;  %v49_v28 = vmax.f32 %v26_v24, %v27_v25  ;;  %v30_v30 = vld [vmem:[%s369_s0 + $0xb0] sm:$0xff] }
   0x8   :  { %78 = vrot.lane.b32.xlu1 %v199_v10, %s158_s22  ;;  %v48_v29 = vmax.f32 %v24_v26, %v25_v27  ;;  %v31_v31 = vld [vmem:[%s369_s0 + $0xb8] sm:$0xff]  ;;  %v28_v32 = vld [vmem:[%s369_s0 + $0xa0] sm:$0xff]  ;;  %v29_v33 = vld [vmem:[%s369_s0 + $0xa8] sm:$0xff] }
   0x9   :  { %74 = vrot.lane.b32.xlu0 %v203_v11, %s158_s22  ;;  %v51_v34 = vmax.f32 %v30_v30, %v31_v31  ;;  %v50_v35 = vmax.f32 %v28_v32, %v29_v33  ;;  %v34_v36 = vld [vmem:[%s369_s0 + $0xd0] sm:$0xff]  ;;  %v35_v37 = vld [vmem:[%s369_s0 + $0xd8] sm:$0xff]  ;;  %v32_v38 = vld [vmem:[%s369_s0 + $0xc0] sm:$0xff] }
   0xa   :  { %v33_v39 = vld [vmem:[%s369_s0 + $0xc8] sm:$0xff]  ;;  %v53_v40 = vmax.f32 %v34_v36, %v35_v37  ;;  %v38_v42 = vld [vmem:[%s369_s0 + $0xf0] sm:$0xff]  ;;  %v39_v43 = vld [vmem:[%s369_s0 + $0xf8] sm:$0xff] }
   0xb   :  { %v52_v41 = vmax.f32 %v32_v38, %v33_v39  ;;  %v36_v44 = vld [vmem:[%s369_s0 + $0xe0] sm:$0xff]  ;;  %v37_v45 = vld [vmem:[%s369_s0 + $0xe8] sm:$0xff]  ;;  %v55_v46 = vmax.f32 %v38_v42, %v39_v43 }
   0xc   :  { %82 = vrot.lane.b32.xlu1 %v219_v16, %s158_s22  ;;  %v54_v47 = vmax.f32 %v36_v44, %v37_v45 }
   0xd   :  { %80 = vrot.lane.b32.xlu0 %v223_v17, %s158_s22 }
  0x10   :  { %86 = vrot.lane.b32.xlu1 %v47_v22, %s158_s22 }
  0x11   :  { %84 = vrot.lane.b32.xlu0 %v46_v23, %s158_s22 }
  0x14   :  { %90 = vrot.lane.b32.xlu1 %v49_v28, %s158_s22 }
  0x15   :  { %88 = vrot.lane.b32.xlu0 %v48_v29, %s158_s22 }
  0x18   :  { %94 = vrot.lane.b32.xlu1 %v51_v34, %s158_s22 }
  0x19   :  { %92 = vrot.lane.b32.xlu0 %v50_v35, %s158_s22 }
  0x1c   :  { %98 = vrot.lane.b32.xlu1 %v53_v40, %s158_s22 }
  0x1d   :  { %96 = vrot.lane.b32.xlu0 %v52_v41, %s158_s22 }
  0x20   :  { %102 = vrot.lane.b32.xlu1 %v55_v46, %s158_s22 }
  0x21   :  { %100 = vrot.lane.b32.xlu0 %v54_v47, %s158_s22 }
  0x76   :  { %v77_v48 = vpop.permute.xlu1 %76 }
  0x77   :  { %v122_v49 = vmax.f32 %v178_v3, %v77_v48  ;;  %v73_v50 = vpop.permute.xlu0 %72 }
  0x78   :  { %v120_v51 = vmax.f32 %v189_v7, %v73_v50 }
  0x79   :  { %139 = vst.msk [vmem:[%s370_s1 + $0x10] sm:$0xff] %vm136_vm0, %v122_v49 }
  0x7a   :  { %137 = vst.msk [vmem:[%s370_s1] sm:$0xff] %vm136_vm0, %v120_v51  ;;  %v79_v52 = vpop.permute.xlu1 %78 }
  0x7b   :  { %v123_v53 = vmax.f32 %v199_v10, %v79_v52  ;;  %v75_v54 = vpop.permute.xlu0 %74 }
  0x7c   :  { %v121_v55 = vmax.f32 %v203_v11, %v75_v54 }
  0x7d   :  { %140 = vst.msk [vmem:[%s370_s1 + $0x18] sm:$0xff] %vm136_vm0, %v123_v53 }
  0x7e   :  { %138 = vst.msk [vmem:[%s370_s1 + $0x8] sm:$0xff] %vm136_vm0, %v121_v55  ;;  %v83_v56 = vpop.permute.xlu1 %82 }
  0x7f   :  { %v125_v57 = vmax.f32 %v219_v16, %v83_v56  ;;  %v81_v58 = vpop.permute.xlu0 %80 }
  0x80   :  { %v124_v59 = vmax.f32 %v223_v17, %v81_v58 }
  0x81   :  { %142 = vst.msk [vmem:[%s370_s1 + $0x28] sm:$0xff] %vm136_vm0, %v125_v57 }
  0x82   :  { %141 = vst.msk [vmem:[%s370_s1 + $0x20] sm:$0xff] %vm136_vm0, %v124_v59  ;;  %v87_v60 = vpop.permute.xlu1 %86 }
  0x83   :  { %v127_v61 = vmax.f32 %v47_v22, %v87_v60  ;;  %v85_v62 = vpop.permute.xlu0 %84 }
  0x84   :  { %v126_v63 = vmax.f32 %v46_v23, %v85_v62 }
  0x85   :  { %144 = vst.msk [vmem:[%s370_s1 + $0x38] sm:$0xff] %vm136_vm0, %v127_v61 }
  0x86   :  { %143 = vst.msk [vmem:[%s370_s1 + $0x30] sm:$0xff] %vm136_vm0, %v126_v63  ;;  %v91_v0 = vpop.permute.xlu1 %90 }
  0x87   :  { %v129_v1 = vmax.f32 %v49_v28, %v91_v0  ;;  %v89_v2 = vpop.permute.xlu0 %88 }
  0x88   :  { %v128_v3 = vmax.f32 %v48_v29, %v89_v2 }
  0x89   :  { %146 = vst.msk [vmem:[%s370_s1 + $0x48] sm:$0xff] %vm136_vm0, %v129_v1 }
  0x8a   :  { %145 = vst.msk [vmem:[%s370_s1 + $0x40] sm:$0xff] %vm136_vm0, %v128_v3  ;;  %v95_v4 = vpop.permute.xlu1 %94 }
  0x8b   :  { %v131_v5 = vmax.f32 %v51_v34, %v95_v4  ;;  %v93_v6 = vpop.permute.xlu0 %92 }
  0x8c   :  { %v130_v7 = vmax.f32 %v50_v35, %v93_v6 }
  0x8d   :  { %148 = vst.msk [vmem:[%s370_s1 + $0x58] sm:$0xff] %vm136_vm0, %v131_v5 }
  0x8e   :  { %147 = vst.msk [vmem:[%s370_s1 + $0x50] sm:$0xff] %vm136_vm0, %v130_v7  ;;  %v99_v8 = vpop.permute.xlu1 %98 }
  0x8f   :  { %v133_v9 = vmax.f32 %v53_v40, %v99_v8  ;;  %v97_v10 = vpop.permute.xlu0 %96 }
  0x90   :  { %v132_v11 = vmax.f32 %v52_v41, %v97_v10 }
  0x91   :  { %150 = vst.msk [vmem:[%s370_s1 + $0x68] sm:$0xff] %vm136_vm0, %v133_v9 }
  0x92   :  { %149 = vst.msk [vmem:[%s370_s1 + $0x60] sm:$0xff] %vm136_vm0, %v132_v11  ;;  %v103_v12 = vpop.permute.xlu1 %102 }
  0x93   :  { %v135_v13 = vmax.f32 %v55_v46, %v103_v12  ;;  %v101_v14 = vpop.permute.xlu0 %100 }
  0x94   :  { %v134_v15 = vmax.f32 %v54_v47, %v101_v14 }
  0x95   :  { %152 = vst.msk [vmem:[%s370_s1 + $0x78] sm:$0xff] %vm136_vm0, %v135_v13 }
  0x96   :  { %151 = vst.msk [vmem:[%s370_s1 + $0x70] sm:$0xff] %vm136_vm0, %v134_v15 }

// kernel: _lambda_.4
= control target key start
LH: loop header
LB: loop body
LE: loop exit
PB: predicated region body
PF: predicated region fallthrough
CT: control target
= control target key end

     0   :  { %s678_s1 = inlined_call_operand.vmem [shape: f32[128,128], index: 1, kind: input, shape index: {}]   ;;  %s679_s0 = inlined_call_operand.vmem [shape: f32[128,128], index: 0, kind: input, shape index: {}]   ;;  %s680_s2 = inlined_call_operand.vmem [shape: f32[1,128], index: 2, kind: input, shape index: {}]   ;;  %s681_s3 = inlined_call_operand.vmem [shape: f32[1,128], index: 3, kind: input, shape index: {}]   ;;  %s682_s4 = inlined_call_operand.vmem [shape: f32[1,128], index: 4, kind: input, shape index: {}]   ;;  %s683_s5 = inlined_call_operand.vmem [shape: f32[128,128], index: 5, kind: output, shape index: {}]  }
   0x1   :  { %v51_v0 = vld [vmem:[%s678_s1 + $0x78] sm:$0xff]  ;;  %v50_v1 = vld [vmem:[%s678_s1 + $0x70] sm:$0xff]  ;;  %v49_v2 = vld [vmem:[%s678_s1 + $0x68] sm:$0xff] }
   0x2   :  { %353 = vmatprep.subr.mxu0 %v51_v0  ;;  %409 = vmatprep.subr.mxu1 %v51_v0  ;;  %v48_v3 = vld [vmem:[%s678_s1 + $0x60] sm:$0xff]  ;;  %v47_v4 = vld [vmem:[%s678_s1 + $0x58] sm:$0xff]  ;;  %v46_v5 = vld [vmem:[%s678_s1 + $0x50] sm:$0xff] }
   0x3   :  { %354 = vmatpush3.msra.mxu0 %v51_v0  ;;  %425 = vmatpush3.msra.mxu1 %v51_v0  ;;  %v45_v6 = vld [vmem:[%s678_s1 + $0x48] sm:$0xff]  ;;  %v44_v7 = vld [vmem:[%s678_s1 + $0x40] sm:$0xff]  ;;  %v43_v8 = vld [vmem:[%s678_s1 + $0x38] sm:$0xff] }
   0x4   :  { %355 = vmatprep.subr.mxu0 %v50_v1  ;;  %410 = vmatprep.subr.mxu1 %v50_v1  ;;  %v42_v9 = vld [vmem:[%s678_s1 + $0x30] sm:$0xff]  ;;  %v41_v10 = vld [vmem:[%s678_s1 + $0x28] sm:$0xff]  ;;  %v40_v11 = vld [vmem:[%s678_s1 + $0x20] sm:$0xff] }
   0x5   :  { %356 = vmatpush3.msra.mxu0 %v50_v1  ;;  %426 = vmatpush3.msra.mxu1 %v50_v1  ;;  %v39_v12 = vld [vmem:[%s678_s1 + $0x18] sm:$0xff]  ;;  %v38_v13 = vld [vmem:[%s678_s1 + $0x10] sm:$0xff]  ;;  %v37_v14 = vld [vmem:[%s678_s1 + $0x8] sm:$0xff] }
   0x6   :  { %357 = vmatprep.subr.mxu0 %v49_v2  ;;  %411 = vmatprep.subr.mxu1 %v49_v2  ;;  %v36_v15 = vld [vmem:[%s678_s1] sm:$0xff]  ;;  %v21_v18 = vld [vmem:[%s679_s0 + $0x8] sm:$0xff]  ;;  %v22_v20 = vld [vmem:[%s679_s0 + $0x10] sm:$0xff] }
   0x7   :  { %358 = vmatpush3.msra.mxu0 %v49_v2  ;;  %427 = vmatpush3.msra.mxu1 %v49_v2  ;;  %v20_v16 = vld [vmem:[%s679_s0] sm:$0xff]  ;;  %v29_v19 = vld [vmem:[%s679_s0 + $0x48] sm:$0xff]  ;;  %v30_v21 = vld [vmem:[%s679_s0 + $0x50] sm:$0xff] }
   0x8   :  { %359 = vmatprep.subr.mxu0 %v48_v3  ;;  %412 = vmatprep.subr.mxu1 %v48_v3  ;;  %v28_v17 = vld [vmem:[%s679_s0 + $0x40] sm:$0xff]  ;;  %v23_v22 = vld [vmem:[%s679_s0 + $0x18] sm:$0xff]  ;;  %v25_v26 = vld [vmem:[%s679_s0 + $0x28] sm:$0xff] }
   0x9   :  { %360 = vmatpush3.msra.mxu0 %v48_v3  ;;  %428 = vmatpush3.msra.mxu1 %v48_v3  ;;  %v31_v23 = vld [vmem:[%s679_s0 + $0x58] sm:$0xff]  ;;  %v24_v24 = vld [vmem:[%s679_s0 + $0x20] sm:$0xff]  ;;  %v33_v27 = vld [vmem:[%s679_s0 + $0x68] sm:$0xff] }
   0xa   :  { %361 = vmatprep.subr.mxu0 %v47_v4  ;;  %413 = vmatprep.subr.mxu1 %v47_v4  ;;  %v32_v25 = vld [vmem:[%s679_s0 + $0x60] sm:$0xff]  ;;  %v26_v28 = vld [vmem:[%s679_s0 + $0x30] sm:$0xff]  ;;  %v27_v30 = vld [vmem:[%s679_s0 + $0x38] sm:$0xff] }
   0xb   :  { %362 = vmatpush3.msra.mxu0 %v47_v4  ;;  %429 = vmatpush3.msra.mxu1 %v47_v4  ;;  %v34_v29 = vld [vmem:[%s679_s0 + $0x70] sm:$0xff]  ;;  %v35_v31 = vld [vmem:[%s679_s0 + $0x78] sm:$0xff]  ;;  %v570_v32 = vld [vmem:[%s680_s2] ss:$0 sm:$0xff] }
   0xc   :  { %363 = vmatprep.subr.mxu0 %v46_v5  ;;  %414 = vmatprep.subr.mxu1 %v46_v5  ;;  %v575_v34 = vld [vmem:[%s681_s3] ss:$0 sm:$0xff] }
   0xd   :  { %364 = vmatpush3.msra.mxu0 %v46_v5  ;;  %430 = vmatpush3.msra.mxu1 %v46_v5  ;;  %v582_v38 = vld [vmem:[%s682_s4] ss:$0 sm:$0xff] }
   0xe   :  { %365 = vmatprep.subr.mxu0 %v45_v6  ;;  %415 = vmatprep.subr.mxu1 %v45_v6 }
   0xf   :  { %366 = vmatpush3.msra.mxu0 %v45_v6  ;;  %431 = vmatpush3.msra.mxu1 %v45_v6 }
  0x10   :  { %367 = vmatprep.subr.mxu0 %v44_v7  ;;  %416 = vmatprep.subr.mxu1 %v44_v7 }
  0x11   :  { %368 = vmatpush3.msra.mxu0 %v44_v7  ;;  %432 = vmatpush3.msra.mxu1 %v44_v7 }
  0x12   :  { %369 = vmatprep.subr.mxu0 %v43_v8  ;;  %417 = vmatprep.subr.mxu1 %v43_v8 }
  0x13   :  { %370 = vmatpush3.msra.mxu0 %v43_v8  ;;  %433 = vmatpush3.msra.mxu1 %v43_v8 }
  0x14   :  { %371 = vmatprep.subr.mxu0 %v42_v9  ;;  %418 = vmatprep.subr.mxu1 %v42_v9 }
  0x15   :  { %372 = vmatpush3.msra.mxu0 %v42_v9  ;;  %434 = vmatpush3.msra.mxu1 %v42_v9 }
  0x16   :  { %373 = vmatprep.subr.mxu0 %v41_v10  ;;  %419 = vmatprep.subr.mxu1 %v41_v10 }
  0x17   :  { %374 = vmatpush3.msra.mxu0 %v41_v10  ;;  %435 = vmatpush3.msra.mxu1 %v41_v10 }
  0x18   :  { %375 = vmatprep.subr.mxu0 %v40_v11  ;;  %420 = vmatprep.subr.mxu1 %v40_v11 }
  0x19   :  { %376 = vmatpush3.msra.mxu0 %v40_v11  ;;  %436 = vmatpush3.msra.mxu1 %v40_v11 }
  0x1a   :  { %377 = vmatprep.subr.mxu0 %v39_v12  ;;  %421 = vmatprep.subr.mxu1 %v39_v12 }
  0x1b   :  { %378 = vmatpush3.msra.mxu0 %v39_v12  ;;  %437 = vmatpush3.msra.mxu1 %v39_v12 }
  0x1c   :  { %379 = vmatprep.subr.mxu0 %v38_v13  ;;  %422 = vmatprep.subr.mxu1 %v38_v13 }
  0x1d   :  { %380 = vmatpush3.msra.mxu0 %v38_v13  ;;  %438 = vmatpush3.msra.mxu1 %v38_v13 }
  0x1e   :  { %381 = vmatprep.subr.mxu0 %v37_v14  ;;  %423 = vmatprep.subr.mxu1 %v37_v14 }
  0x1f   :  { %382 = vmatpush3.msra.mxu0 %v37_v14  ;;  %439 = vmatpush3.msra.mxu1 %v37_v14 }
  0x20   :  { %383 = vmatprep.subr.mxu0 %v36_v15  ;;  %424 = vmatprep.subr.mxu1 %v36_v15 }
  0x21   :  { %384 = vmatpush3.msra.mxu0 %v36_v15  ;;  %440 = vmatpush3.msra.mxu1 %v36_v15 }
  0x22   :  { %385 = vmatprep.mubr.f32.mxu0 %v20_v16  ;;  %397 = vmatprep.mubr.f32.mxu1 %v28_v17 }
  0x23   :  { %386 = vmatmul.mubr.f32.vlgmr.msra.gmra.mxu0 %v21_v18  ;;  %398 = vmatmul.mubr.f32.vlgmr.msra.gmra.mxu1 %v29_v19 }
  0x24   :  { %388 = vmatprep.mubr.f32.mxu0 %v22_v20  ;;  %400 = vmatprep.mubr.f32.mxu1 %v30_v21 }
  0x27   :  { %389 = vmatmul.mubr.f32.gmra.mxu0 %v23_v22  ;;  %401 = vmatmul.mubr.f32.gmra.mxu1 %v31_v23 }
  0x28   :  { %391 = vmatprep.mubr.f32.mxu0 %v24_v24  ;;  %403 = vmatprep.mubr.f32.mxu1 %v32_v25 }
  0x2b   :  { %392 = vmatmul.mubr.f32.gmra.mxu0 %v25_v26  ;;  %404 = vmatmul.mubr.f32.gmra.mxu1 %v33_v27 }
  0x2c   :  { %394 = vmatprep.mubr.f32.mxu0 %v26_v28  ;;  %406 = vmatprep.mubr.f32.mxu1 %v34_v29 }
  0x2f   :  { %395 = vmatmul.mubr.f32.gmra.mxu0 %v27_v30  ;;  %407 = vmatmul.mubr.f32.gmra.mxu1 %v35_v31 }
  0xe3   :  { %v387_v33 = vpop.f32.mrf.mxu0  ;;  %v399_v35 = vpop.f32.mrf.mxu1 }
  0xe4   :  { %v205_v36 = vmul.f32 %v387_v33, %v570_v32  ;;  %v213_v37 = vmul.f32 %v399_v35, %v570_v32 }
  0xe5   :  { %v118_v39 = vpop.f32.mrf.mxu0  ;;  %v158_v40 = vpop.f32.mrf.mxu1 }
  0xe6   :  { %v228_v41 = vadd.f32 %v575_v34, %v205_v36  ;;  %v236_v42 = vadd.f32 %v575_v34, %v213_v37  ;;  %v204_v43 = vmul.f32 %v570_v32, %v118_v39  ;;  %v212_v44 = vmul.f32 %v570_v32, %v158_v40 }
  0xe7   :  { %v390_v45 = vpop.f32.mrf.mxu0  ;;  %v402_v46 = vpop.f32.mrf.mxu1 }
  0xe8   :  { %vm244_vm0 = vcmp.gt.f32.partialorder %v228_v41, 0.0  ;;  %v267_v47 = vmul.f32 %v582_v38, %v228_v41  ;;  %vm252_vm1 = vcmp.gt.f32.partialorder %v236_v42, 0.0  ;;  %v275_v48 = vmul.f32 %v582_v38, %v236_v42 }
  0xe9   :  { %v227_v49 = vadd.f32 %v575_v34, %v204_v43  ;;  %v235_v50 = vadd.f32 %v575_v34, %v212_v44  ;;  %v207_v51 = vmul.f32 %v390_v45, %v570_v32  ;;  %v215_v52 = vmul.f32 %v402_v46, %v570_v32  ;;  %v128_v53 = vpop.f32.mrf.mxu0  ;;  %v168_v54 = vpop.f32.mrf.mxu1 }
  0xea   :  { %v283_v55 = vsel %vm244_vm0, %v228_v41, %v267_v47  ;;  %v291_v56 = vsel %vm252_vm1, %v236_v42, %v275_v48  ;;  %v206_v57 = vmul.f32 %v570_v32, %v128_v53  ;;  %v214_v58 = vmul.f32 %v570_v32, %v168_v54 }
  0xeb   :  { %299 = vst [vmem:[%s683_s5 + $0x8] sm:$0xff] %v283_v55  ;;  %307 = vst [vmem:[%s683_s5 + $0x48] sm:$0xff] %v291_v56  ;;  %vm243_vm2 = vcmp.gt.f32.partialorder %v227_v49, 0.0  ;;  %v266_v59 = vmul.f32 %v582_v38, %v227_v49  ;;  %vm251_vm3 = vcmp.gt.f32.partialorder %v235_v50, 0.0  ;;  %v274_v60 = vmul.f32 %v582_v38, %v235_v50  ;;  %v393_v61 = vpop.f32.mrf.mxu0  ;;  %v405_v62 = vpop.f32.mrf.mxu1 }
  0xec   :  { %v230_v63 = vadd.f32 %v575_v34, %v207_v51  ;;  %v238_v0 = vadd.f32 %v575_v34, %v215_v52  ;;  %v229_v1 = vadd.f32 %v575_v34, %v206_v57  ;;  %v237_v2 = vadd.f32 %v575_v34, %v214_v58 }
  0xed   :  { %v282_v3 = vsel %vm243_vm2, %v227_v49, %v266_v59  ;;  %v290_v4 = vsel %vm251_vm3, %v235_v50, %v274_v60  ;;  %v209_v5 = vmul.f32 %v393_v61, %v570_v32  ;;  %v217_v6 = vmul.f32 %v405_v62, %v570_v32  ;;  %v138_v7 = vpop.f32.mrf.mxu0  ;;  %v178_v8 = vpop.f32.mrf.mxu1 }
  0xee   :  { %298 = vst [vmem:[%s683_s5] sm:$0xff] %v282_v3  ;;  %306 = vst [vmem:[%s683_s5 + $0x40] sm:$0xff] %v290_v4  ;;  %vm246_vm4 = vcmp.gt.f32.partialorder %v230_v63, 0.0  ;;  %v269_v9 = vmul.f32 %v582_v38, %v230_v63  ;;  %vm254_vm5 = vcmp.gt.f32.partialorder %v238_v0, 0.0  ;;  %v277_v10 = vmul.f32 %v582_v38, %v238_v0 }
  0xef   :  { %vm245_vm6 = vcmp.gt.f32.partialorder %v229_v1, 0.0  ;;  %v268_v11 = vmul.f32 %v582_v38, %v229_v1  ;;  %vm253_vm7 = vcmp.gt.f32.partialorder %v237_v2, 0.0  ;;  %v276_v12 = vmul.f32 %v582_v38, %v237_v2  ;;  %v396_v13 = vpop.f32.mrf.mxu0  ;;  %v408_v14 = vpop.f32.mrf.mxu1 }
  0xf0   :  { %v285_v15 = vsel %vm246_vm4, %v230_v63, %v269_v9  ;;  %v293_v16 = vsel %vm254_vm5, %v238_v0, %v277_v10  ;;  %v232_v17 = vadd.f32 %v575_v34, %v209_v5  ;;  %v240_v18 = vadd.f32 %v575_v34, %v217_v6 }
  0xf1   :  { %301 = vst [vmem:[%s683_s5 + $0x18] sm:$0xff] %v285_v15  ;;  %309 = vst [vmem:[%s683_s5 + $0x58] sm:$0xff] %v293_v16  ;;  %v284_v19 = vsel %vm245_vm6, %v229_v1, %v268_v11  ;;  %v292_v20 = vsel %vm253_vm7, %v237_v2, %v276_v12  ;;  %v208_v21 = vmul.f32 %v570_v32, %v138_v7  ;;  %v148_v23 = vpop.f32.mrf.mxu0  ;;  %v188_v24 = vpop.f32.mrf.mxu1 }
  0xf2   :  { %v216_v22 = vmul.f32 %v570_v32, %v178_v8  ;;  %300 = vst [vmem:[%s683_s5 + $0x10] sm:$0xff] %v284_v19  ;;  %308 = vst [vmem:[%s683_s5 + $0x50] sm:$0xff] %v292_v20  ;;  %vm248_vm8 = vcmp.gt.f32.partialorder %v232_v17, 0.0  ;;  %v271_v25 = vmul.f32 %v582_v38, %v232_v17  ;;  %vm256_vm9 = vcmp.gt.f32.partialorder %v240_v18, 0.0 }
  0xf3   :  { %v279_v26 = vmul.f32 %v582_v38, %v240_v18  ;;  %v231_v27 = vadd.f32 %v575_v34, %v208_v21  ;;  %v211_v29 = vmul.f32 %v396_v13, %v570_v32  ;;  %v219_v30 = vmul.f32 %v408_v14, %v570_v32 }
  0xf4   :  { %v239_v28 = vadd.f32 %v575_v34, %v216_v22  ;;  %v287_v31 = vsel %vm248_vm8, %v232_v17, %v271_v25  ;;  %v210_v35 = vmul.f32 %v570_v32, %v148_v23  ;;  %v218_v36 = vmul.f32 %v570_v32, %v188_v24 }
  0xf5   :  { %v295_v33 = vsel %vm256_vm9, %v240_v18, %v279_v26  ;;  %303 = vst [vmem:[%s683_s5 + $0x28] sm:$0xff] %v287_v31  ;;  %vm247_vm10 = vcmp.gt.f32.partialorder %v231_v27, 0.0  ;;  %v270_v37 = vmul.f32 %v582_v38, %v231_v27  ;;  %v234_v40 = vadd.f32 %v575_v34, %v211_v29 }
  0xf6   :  { %311 = vst [vmem:[%s683_s5 + $0x68] sm:$0xff] %v295_v33  ;;  %vm255_vm11 = vcmp.gt.f32.partialorder %v239_v28, 0.0  ;;  %v278_v39 = vmul.f32 %v582_v38, %v239_v28  ;;  %v242_v41 = vadd.f32 %v575_v34, %v219_v30  ;;  %v233_v32 = vadd.f32 %v575_v34, %v210_v35 }
  0xf7   :  { %v241_v42 = vadd.f32 %v575_v34, %v218_v36  ;;  %v286_v43 = vsel %vm247_vm10, %v231_v27, %v270_v37  ;;  %vm250_vm12 = vcmp.gt.f32.partialorder %v234_v40, 0.0  ;;  %v273_v45 = vmul.f32 %v582_v38, %v234_v40 }
  0xf8   :  { %v294_v44 = vsel %vm255_vm11, %v239_v28, %v278_v39  ;;  %302 = vst [vmem:[%s683_s5 + $0x20] sm:$0xff] %v286_v43  ;;  %vm258_vm13 = vcmp.gt.f32.partialorder %v242_v41, 0.0  ;;  %v281_v46 = vmul.f32 %v582_v38, %v242_v41  ;;  %vm249_vm14 = vcmp.gt.f32.partialorder %v233_v32, 0.0 }
  0xf9   :  { %310 = vst [vmem:[%s683_s5 + $0x60] sm:$0xff] %v294_v44  ;;  %v272_v47 = vmul.f32 %v582_v38, %v233_v32  ;;  %vm257_vm15 = vcmp.gt.f32.partialorder %v241_v42, 0.0  ;;  %v280_v34 = vmul.f32 %v582_v38, %v241_v42  ;;  %v289_v48 = vsel %vm250_vm12, %v234_v40, %v273_v45 }
  0xfa   :  { %v297_v49 = vsel %vm258_vm13, %v242_v41, %v281_v46  ;;  %305 = vst [vmem:[%s683_s5 + $0x38] sm:$0xff] %v289_v48 }
  0xfb   :  { %313 = vst [vmem:[%s683_s5 + $0x78] sm:$0xff] %v297_v49  ;;  %v288_v50 = vsel %vm249_vm14, %v233_v32, %v272_v47  ;;  %v296_v51 = vsel %vm257_vm15, %v241_v42, %v280_v34 }
  0xfc   :  { %304 = vst [vmem:[%s683_s5 + $0x30] sm:$0xff] %v288_v50  ;;  %312 = vst [vmem:[%s683_s5 + $0x70] sm:$0xff] %v296_v51 }

// kernel: _lambda_.5
= control target key start
LH: loop header
LB: loop body
LE: loop exit
PB: predicated region body
PF: predicated region fallthrough
CT: control target
= control target key end

     0   :  { %s1247_s1 = inlined_call_operand.vmem [shape: f32[512,128], index: 1, kind: input, shape index: {}]   ;;  %s1248_s0 = inlined_call_operand.vmem [shape: f32[128,512], index: 0, kind: input, shape index: {}]   ;;  %s1249_s2 = inlined_call_operand.vmem [shape: f32[1,128], index: 2, kind: input, shape index: {}]   ;;  %s1250_s3 = inlined_call_operand.vmem [shape: f32[1,128], index: 3, kind: input, shape index: {}]   ;;  %s1251_s4 = inlined_call_operand.vmem [shape: f32[1,128], index: 4, kind: input, shape index: {}]   ;;  %s1252_s5 = inlined_call_operand.vmem [shape: f32[128,128], index: 5, kind: output, shape index: {}]  }
   0x1   :  { %v115_v0 = vld [vmem:[%s1247_s1 + $0xf8] sm:$0xff]  ;;  %v114_v4 = vld [vmem:[%s1247_s1 + $0xf0] sm:$0xff]  ;;  %v113_v8 = vld [vmem:[%s1247_s1 + $0xe8] sm:$0xff] }
   0x2   :  { %v147_v1 = vld [vmem:[%s1247_s1 + $0x1f8] sm:$0xff]  ;;  %562 = vmatprep.subr.mxu0 %v115_v0  ;;  %v146_v5 = vld [vmem:[%s1247_s1 + $0x1f0] sm:$0xff]  ;;  %v145_v9 = vld [vmem:[%s1247_s1 + $0x1e8] sm:$0xff] }
   0x3   :  { %v99_v2 = vld [vmem:[%s1247_s1 + $0x78] sm:$0xff]  ;;  %642 = vmatprep.subr.mxu1 %v147_v1  ;;  %v98_v6 = vld [vmem:[%s1247_s1 + $0x70] sm:$0xff]  ;;  %v97_v10 = vld [vmem:[%s1247_s1 + $0x68] sm:$0xff] }
   0x4   :  { %v131_v3 = vld [vmem:[%s1247_s1 + $0x178] sm:$0xff]  ;;  %563 = vmatpush3.msra.mxu0 %v99_v2  ;;  %v130_v7 = vld [vmem:[%s1247_s1 + $0x170] sm:$0xff]  ;;  %v129_v11 = vld [vmem:[%s1247_s1 + $0x168] sm:$0xff] }
   0x5   :  { %643 = vmatpush3.msra.mxu1 %v131_v3  ;;  %564 = vmatprep.subr.mxu0 %v114_v4  ;;  %v112_v12 = vld [vmem:[%s1247_s1 + $0xe0] sm:$0xff]  ;;  %v111_v16 = vld [vmem:[%s1247_s1 + $0xd8] sm:$0xff]  ;;  %v110_v20 = vld [vmem:[%s1247_s1 + $0xd0] sm:$0xff] }
   0x6   :  { %644 = vmatprep.subr.mxu1 %v146_v5  ;;  %565 = vmatpush3.msra.mxu0 %v98_v6  ;;  %v144_v13 = vld [vmem:[%s1247_s1 + $0x1e0] sm:$0xff]  ;;  %v143_v17 = vld [vmem:[%s1247_s1 + $0x1d8] sm:$0xff]  ;;  %v142_v21 = vld [vmem:[%s1247_s1 + $0x1d0] sm:$0xff] }
   0x7   :  { %645 = vmatpush3.msra.mxu1 %v130_v7  ;;  %566 = vmatprep.subr.mxu0 %v113_v8  ;;  %v96_v14 = vld [vmem:[%s1247_s1 + $0x60] sm:$0xff]  ;;  %v95_v18 = vld [vmem:[%s1247_s1 + $0x58] sm:$0xff]  ;;  %v94_v22 = vld [vmem:[%s1247_s1 + $0x50] sm:$0xff] }
   0x8   :  { %646 = vmatprep.subr.mxu1 %v145_v9  ;;  %v128_v15 = vld [vmem:[%s1247_s1 + $0x160] sm:$0xff]  ;;  %567 = vmatpush3.msra.mxu0 %v97_v10  ;;  %v127_v19 = vld [vmem:[%s1247_s1 + $0x158] sm:$0xff]  ;;  %v126_v23 = vld [vmem:[%s1247_s1 + $0x150] sm:$0xff] }
   0x9   :  { %647 = vmatpush3.msra.mxu1 %v129_v11  ;;  %568 = vmatprep.subr.mxu0 %v112_v12  ;;  %v109_v24 = vld [vmem:[%s1247_s1 + $0xc8] sm:$0xff]  ;;  %v108_v28 = vld [vmem:[%s1247_s1 + $0xc0] sm:$0xff]  ;;  %v107_v32 = vld [vmem:[%s1247_s1 + $0xb8] sm:$0xff] }
   0xa   :  { %648 = vmatprep.subr.mxu1 %v144_v13  ;;  %569 = vmatpush3.msra.mxu0 %v96_v14  ;;  %v141_v25 = vld [vmem:[%s1247_s1 + $0x1c8] sm:$0xff]  ;;  %v140_v29 = vld [vmem:[%s1247_s1 + $0x1c0] sm:$0xff]  ;;  %v139_v33 = vld [vmem:[%s1247_s1 + $0x1b8] sm:$0xff] }
   0xb   :  { %649 = vmatpush3.msra.mxu1 %v128_v15  ;;  %570 = vmatprep.subr.mxu0 %v111_v16  ;;  %v93_v26 = vld [vmem:[%s1247_s1 + $0x48] sm:$0xff]  ;;  %v92_v30 = vld [vmem:[%s1247_s1 + $0x40] sm:$0xff]  ;;  %v91_v34 = vld [vmem:[%s1247_s1 + $0x38] sm:$0xff] }
   0xc   :  { %650 = vmatprep.subr.mxu1 %v143_v17  ;;  %571 = vmatpush3.msra.mxu0 %v95_v18  ;;  %v125_v27 = vld [vmem:[%s1247_s1 + $0x148] sm:$0xff]  ;;  %v124_v31 = vld [vmem:[%s1247_s1 + $0x140] sm:$0xff]  ;;  %v123_v35 = vld [vmem:[%s1247_s1 + $0x138] sm:$0xff] }
   0xd   :  { %651 = vmatpush3.msra.mxu1 %v127_v19  ;;  %572 = vmatprep.subr.mxu0 %v110_v20  ;;  %v106_v36 = vld [vmem:[%s1247_s1 + $0xb0] sm:$0xff]  ;;  %v105_v40 = vld [vmem:[%s1247_s1 + $0xa8] sm:$0xff]  ;;  %v104_v44 = vld [vmem:[%s1247_s1 + $0xa0] sm:$0xff] }
   0xe   :  { %652 = vmatprep.subr.mxu1 %v142_v21  ;;  %573 = vmatpush3.msra.mxu0 %v94_v22  ;;  %v138_v37 = vld [vmem:[%s1247_s1 + $0x1b0] sm:$0xff]  ;;  %v137_v41 = vld [vmem:[%s1247_s1 + $0x1a8] sm:$0xff]  ;;  %v136_v45 = vld [vmem:[%s1247_s1 + $0x1a0] sm:$0xff] }
   0xf   :  { %653 = vmatpush3.msra.mxu1 %v126_v23  ;;  %574 = vmatprep.subr.mxu0 %v109_v24  ;;  %v90_v38 = vld [vmem:[%s1247_s1 + $0x30] sm:$0xff]  ;;  %v89_v42 = vld [vmem:[%s1247_s1 + $0x28] sm:$0xff]  ;;  %v88_v46 = vld [vmem:[%s1247_s1 + $0x20] sm:$0xff] }
  0x10   :  { %654 = vmatprep.subr.mxu1 %v141_v25  ;;  %575 = vmatpush3.msra.mxu0 %v93_v26  ;;  %v122_v39 = vld [vmem:[%s1247_s1 + $0x130] sm:$0xff]  ;;  %v121_v43 = vld [vmem:[%s1247_s1 + $0x128] sm:$0xff]  ;;  %v120_v47 = vld [vmem:[%s1247_s1 + $0x120] sm:$0xff] }
  0x11   :  { %655 = vmatpush3.msra.mxu1 %v125_v27  ;;  %576 = vmatprep.subr.mxu0 %v108_v28  ;;  %v103_v48 = vld [vmem:[%s1247_s1 + $0x98] sm:$0xff]  ;;  %v102_v52 = vld [vmem:[%s1247_s1 + $0x90] sm:$0xff]  ;;  %v101_v56 = vld [vmem:[%s1247_s1 + $0x88] sm:$0xff] }
  0x12   :  { %656 = vmatprep.subr.mxu1 %v140_v29  ;;  %577 = vmatpush3.msra.mxu0 %v92_v30  ;;  %v135_v49 = vld [vmem:[%s1247_s1 + $0x198] sm:$0xff]  ;;  %v134_v53 = vld [vmem:[%s1247_s1 + $0x190] sm:$0xff]  ;;  %v133_v57 = vld [vmem:[%s1247_s1 + $0x188] sm:$0xff] }
  0x13   :  { %657 = vmatpush3.msra.mxu1 %v124_v31  ;;  %578 = vmatprep.subr.mxu0 %v107_v32  ;;  %v87_v50 = vld [vmem:[%s1247_s1 + $0x18] sm:$0xff]  ;;  %v86_v54 = vld [vmem:[%s1247_s1 + $0x10] sm:$0xff]  ;;  %v85_v58 = vld [vmem:[%s1247_s1 + $0x8] sm:$0xff] }
  0x14   :  { %658 = vmatprep.subr.mxu1 %v139_v33  ;;  %579 = vmatpush3.msra.mxu0 %v91_v34  ;;  %v119_v51 = vld [vmem:[%s1247_s1 + $0x118] sm:$0xff]  ;;  %v118_v55 = vld [vmem:[%s1247_s1 + $0x110] sm:$0xff]  ;;  %v117_v59 = vld [vmem:[%s1247_s1 + $0x108] sm:$0xff] }
  0x15   :  { %659 = vmatpush3.msra.mxu1 %v123_v35  ;;  %580 = vmatprep.subr.mxu0 %v106_v36  ;;  %v100_v60 = vld [vmem:[%s1247_s1 + $0x80] sm:$0xff]  ;;  %v21_v63 = vld [vmem:[%s1248_s0 + $0x8] sm:$0xff]  ;;  %v23_v1 = vld [vmem:[%s1248_s0 + $0x18] sm:$0xff] }
  0x16   :  { %660 = vmatprep.subr.mxu1 %v138_v37  ;;  %581 = vmatpush3.msra.mxu0 %v90_v38  ;;  %v132_v61 = vld [vmem:[%s1247_s1 + $0x180] sm:$0xff]  ;;  %v22_v3 = vld [vmem:[%s1248_s0 + $0x10] sm:$0xff]  ;;  %v25_v4 = vld [vmem:[%s1248_s0 + $0x28] sm:$0xff] }
  0x17   :  { %661 = vmatpush3.msra.mxu1 %v122_v39  ;;  %582 = vmatprep.subr.mxu0 %v105_v40  ;;  %v84_v62 = vld [vmem:[%s1247_s1] sm:$0xff]  ;;  %v27_v5 = vld [vmem:[%s1248_s0 + $0x38] sm:$0xff]  ;;  %v26_v7 = vld [vmem:[%s1248_s0 + $0x30] sm:$0xff] }
  0x18   :  { %662 = vmatprep.subr.mxu1 %v137_v41  ;;  %583 = vmatpush3.msra.mxu0 %v89_v42  ;;  %v116_v0 = vld [vmem:[%s1247_s1 + $0x100] sm:$0xff]  ;;  %v29_v8 = vld [vmem:[%s1248_s0 + $0x48] sm:$0xff]  ;;  %v31_v9 = vld [vmem:[%s1248_s0 + $0x58] sm:$0xff] }
  0x19   :  { %663 = vmatpush3.msra.mxu1 %v121_v43  ;;  %584 = vmatprep.subr.mxu0 %v104_v44  ;;  %v20_v2 = vld [vmem:[%s1248_s0] sm:$0xff]  ;;  %v30_v11 = vld [vmem:[%s1248_s0 + $0x50] sm:$0xff]  ;;  %v33_v12 = vld [vmem:[%s1248_s0 + $0x68] sm:$0xff] }
  0x1a   :  { %664 = vmatprep.subr.mxu1 %v136_v45  ;;  %585 = vmatpush3.msra.mxu0 %v88_v46  ;;  %v24_v6 = vld [vmem:[%s1248_s0 + $0x20] sm:$0xff]  ;;  %v35_v13 = vld [vmem:[%s1248_s0 + $0x78] sm:$0xff]  ;;  %v34_v15 = vld [vmem:[%s1248_s0 + $0x70] sm:$0xff] }
  0x1b   :  { %665 = vmatpush3.msra.mxu1 %v120_v47  ;;  %586 = vmatprep.subr.mxu0 %v103_v48  ;;  %v28_v10 = vld [vmem:[%s1248_s0 + $0x40] sm:$0xff]  ;;  %v37_v16 = vld [vmem:[%s1248_s0 + $0x88] sm:$0xff]  ;;  %v39_v17 = vld [vmem:[%s1248_s0 + $0x98] sm:$0xff] }
  0x1c   :  { %666 = vmatprep.subr.mxu1 %v135_v49  ;;  %587 = vmatpush3.msra.mxu0 %v87_v50  ;;  %v32_v14 = vld [vmem:[%s1248_s0 + $0x60] sm:$0xff]  ;;  %v38_v19 = vld [vmem:[%s1248_s0 + $0x90] sm:$0xff]  ;;  %v41_v20 = vld [vmem:[%s1248_s0 + $0xa8] sm:$0xff] }
  0x1d   :  { %667 = vmatpush3.msra.mxu1 %v119_v51  ;;  %588 = vmatprep.subr.mxu0 %v102_v52  ;;  %v36_v18 = vld [vmem:[%s1248_s0 + $0x80] sm:$0xff]  ;;  %v43_v21 = vld [vmem:[%s1248_s0 + $0xb8] sm:$0xff]  ;;  %v42_v23 = vld [vmem:[%s1248_s0 + $0xb0] sm:$0xff] }
  0x1e   :  { %668 = vmatprep.subr.mxu1 %v134_v53  ;;  %589 = vmatpush3.msra.mxu0 %v86_v54  ;;  %v40_v22 = vld [vmem:[%s1248_s0 + $0xa0] sm:$0xff]  ;;  %v45_v24 = vld [vmem:[%s1248_s0 + $0xc8] sm:$0xff]  ;;  %v47_v25 = vld [vmem:[%s1248_s0 + $0xd8] sm:$0xff] }
  0x1f   :  { %669 = vmatpush3.msra.mxu1 %v118_v55  ;;  %590 = vmatprep.subr.mxu0 %v101_v56  ;;  %v44_v26 = vld [vmem:[%s1248_s0 + $0xc0] sm:$0xff]  ;;  %v46_v27 = vld [vmem:[%s1248_s0 + $0xd0] sm:$0xff]  ;;  %v49_v28 = vld [vmem:[%s1248_s0 + $0xe8] sm:$0xff] }
  0x20   :  { %670 = vmatprep.subr.mxu1 %v133_v57  ;;  %591 = vmatpush3.msra.mxu0 %v85_v58  ;;  %v51_v29 = vld [vmem:[%s1248_s0 + $0xf8] sm:$0xff]  ;;  %v48_v30 = vld [vmem:[%s1248_s0 + $0xe0] sm:$0xff]  ;;  %v50_v31 = vld [vmem:[%s1248_s0 + $0xf0] sm:$0xff] }
  0x21   :  { %671 = vmatpush3.msra.mxu1 %v117_v59  ;;  %592 = vmatprep.subr.mxu0 %v100_v60  ;;  %v53_v32 = vld [vmem:[%s1248_s0 + $0x108] sm:$0xff]  ;;  %v55_v33 = vld [vmem:[%s1248_s0 + $0x118] sm:$0xff]  ;;  %v52_v34 = vld [vmem:[%s1248_s0 + $0x100] sm:$0xff] }
  0x22   :  { %672 = vmatprep.subr.mxu1 %v132_v61  ;;  %593 = vmatpush3.msra.mxu0 %v84_v62  ;;  %v54_v35 = vld [vmem:[%s1248_s0 + $0x110] sm:$0xff]  ;;  %v57_v36 = vld [vmem:[%s1248_s0 + $0x128] sm:$0xff]  ;;  %v59_v37 = vld [vmem:[%s1248_s0 + $0x138] sm:$0xff] }
  0x23   :  { %212 = vmatprep.mubr.f32.mxu0 %v21_v63  ;;  %673 = vmatpush3.msra.mxu1 %v116_v0  ;;  %v56_v38 = vld [vmem:[%s1248_s0 + $0x120] sm:$0xff]  ;;  %v58_v39 = vld [vmem:[%s1248_s0 + $0x130] sm:$0xff]  ;;  %v61_v40 = vld [vmem:[%s1248_s0 + $0x148] sm:$0xff] }
  0x24   :  { %357 = vmatprep.mubr.f32.mxu1 %v23_v1  ;;  %213 = vmatmul.mubr.f32.vlgmr.msra.gmra.mxu0 %v20_v2  ;;  %v63_v41 = vld [vmem:[%s1248_s0 + $0x158] sm:$0xff]  ;;  %v60_v42 = vld [vmem:[%s1248_s0 + $0x140] sm:$0xff]  ;;  %v62_v43 = vld [vmem:[%s1248_s0 + $0x150] sm:$0xff] }
  0x25   :  { %358 = vmatmul.mubr.f32.vlgmr.msra.gmra.mxu1 %v22_v3  ;;  %217 = vmatprep.mubr.f32.mxu0 %v25_v4  ;;  %v65_v44 = vld [vmem:[%s1248_s0 + $0x168] sm:$0xff]  ;;  %v67_v45 = vld [vmem:[%s1248_s0 + $0x178] sm:$0xff]  ;;  %v64_v46 = vld [vmem:[%s1248_s0 + $0x160] sm:$0xff] }
  0x26   :  { %362 = vmatprep.mubr.f32.mxu1 %v27_v5  ;;  %v66_v47 = vld [vmem:[%s1248_s0 + $0x170] sm:$0xff]  ;;  %v69_v48 = vld [vmem:[%s1248_s0 + $0x188] sm:$0xff]  ;;  %v71_v49 = vld [vmem:[%s1248_s0 + $0x198] sm:$0xff] }
  0x27   :  { %v68_v50 = vld [vmem:[%s1248_s0 + $0x180] sm:$0xff]  ;;  %v70_v51 = vld [vmem:[%s1248_s0 + $0x190] sm:$0xff]  ;;  %v73_v52 = vld [vmem:[%s1248_s0 + $0x1a8] sm:$0xff] }
  0x28   :  { %218 = vmatmul.mubr.f32.gmra.mxu0 %v24_v6  ;;  %v75_v53 = vld [vmem:[%s1248_s0 + $0x1b8] sm:$0xff]  ;;  %v72_v54 = vld [vmem:[%s1248_s0 + $0x1a0] sm:$0xff]  ;;  %v74_v55 = vld [vmem:[%s1248_s0 + $0x1b0] sm:$0xff] }
  0x29   :  { %363 = vmatmul.mubr.f32.gmra.mxu1 %v26_v7  ;;  %222 = vmatprep.mubr.f32.mxu0 %v29_v8  ;;  %v77_v56 = vld [vmem:[%s1248_s0 + $0x1c8] sm:$0xff]  ;;  %v79_v57 = vld [vmem:[%s1248_s0 + $0x1d8] sm:$0xff]  ;;  %v76_v58 = vld [vmem:[%s1248_s0 + $0x1c0] sm:$0xff] }
  0x2a   :  { %367 = vmatprep.mubr.f32.mxu1 %v31_v9  ;;  %v78_v59 = vld [vmem:[%s1248_s0 + $0x1d0] sm:$0xff]  ;;  %v81_v60 = vld [vmem:[%s1248_s0 + $0x1e8] sm:$0xff]  ;;  %v83_v61 = vld [vmem:[%s1248_s0 + $0x1f8] sm:$0xff] }
  0x2b   :  { %v80_v62 = vld [vmem:[%s1248_s0 + $0x1e0] sm:$0xff]  ;;  %v82_v63 = vld [vmem:[%s1248_s0 + $0x1f0] sm:$0xff] }
  0x2c   :  { %223 = vmatmul.mubr.f32.gmra.mxu0 %v28_v10  ;;  %v1139_v6 = vld [vmem:[%s1249_s2] ss:$0 sm:$0xff] }
  0x2d   :  { %368 = vmatmul.mubr.f32.gmra.mxu1 %v30_v11  ;;  %227 = vmatprep.mubr.f32.mxu0 %v33_v12  ;;  %v1144_v10 = vld [vmem:[%s1250_s3] ss:$0 sm:$0xff] }
  0x2e   :  { %372 = vmatprep.mubr.f32.mxu1 %v35_v13 }
  0x30   :  { %228 = vmatmul.mubr.f32.gmra.mxu0 %v32_v14 }
  0x31   :  { %373 = vmatmul.mubr.f32.gmra.mxu1 %v34_v15  ;;  %232 = vmatprep.mubr.f32.mxu0 %v37_v16  ;;  %v1150_v16 = vld [vmem:[%s1251_s4] ss:$0 sm:$0xff] }
  0x32   :  { %377 = vmatprep.mubr.f32.mxu1 %v39_v17 }
  0x34   :  { %233 = vmatmul.mubr.f32.gmra.mxu0 %v36_v18 }
  0x35   :  { %378 = vmatmul.mubr.f32.gmra.mxu1 %v38_v19  ;;  %237 = vmatprep.mubr.f32.mxu0 %v41_v20 }
  0x36   :  { %382 = vmatprep.mubr.f32.mxu1 %v43_v21 }
  0x38   :  { %238 = vmatmul.mubr.f32.gmra.mxu0 %v40_v22 }
  0x39   :  { %383 = vmatmul.mubr.f32.gmra.mxu1 %v42_v23  ;;  %242 = vmatprep.mubr.f32.mxu0 %v45_v24 }
  0x3a   :  { %387 = vmatprep.mubr.f32.mxu1 %v47_v25 }
  0x3c   :  { %243 = vmatmul.mubr.f32.gmra.mxu0 %v44_v26 }
  0x3d   :  { %388 = vmatmul.mubr.f32.gmra.mxu1 %v46_v27  ;;  %247 = vmatprep.mubr.f32.mxu0 %v49_v28 }
  0x3e   :  { %392 = vmatprep.mubr.f32.mxu1 %v51_v29 }
  0x40   :  { %248 = vmatmul.mubr.f32.gmra.mxu0 %v48_v30 }
  0x41   :  { %393 = vmatmul.mubr.f32.gmra.mxu1 %v50_v31  ;;  %252 = vmatprep.mubr.f32.mxu0 %v53_v32 }
  0x42   :  { %397 = vmatprep.mubr.f32.mxu1 %v55_v33 }
  0x44   :  { %253 = vmatmul.mubr.f32.gmra.mxu0 %v52_v34 }
  0x45   :  { %398 = vmatmul.mubr.f32.gmra.mxu1 %v54_v35  ;;  %257 = vmatprep.mubr.f32.mxu0 %v57_v36 }
  0x46   :  { %402 = vmatprep.mubr.f32.mxu1 %v59_v37 }
  0x48   :  { %258 = vmatmul.mubr.f32.gmra.mxu0 %v56_v38 }
  0x49   :  { %403 = vmatmul.mubr.f32.gmra.mxu1 %v58_v39  ;;  %262 = vmatprep.mubr.f32.mxu0 %v61_v40 }
  0x4a   :  { %407 = vmatprep.mubr.f32.mxu1 %v63_v41 }
  0x4c   :  { %263 = vmatmul.mubr.f32.gmra.mxu0 %v60_v42 }
  0x4d   :  { %408 = vmatmul.mubr.f32.gmra.mxu1 %v62_v43  ;;  %267 = vmatprep.mubr.f32.mxu0 %v65_v44 }
  0x4e   :  { %412 = vmatprep.mubr.f32.mxu1 %v67_v45 }
  0x50   :  { %268 = vmatmul.mubr.f32.gmra.mxu0 %v64_v46 }
  0x51   :  { %413 = vmatmul.mubr.f32.gmra.mxu1 %v66_v47  ;;  %272 = vmatprep.mubr.f32.mxu0 %v69_v48 }
  0x52   :  { %417 = vmatprep.mubr.f32.mxu1 %v71_v49 }
  0x54   :  { %273 = vmatmul.mubr.f32.gmra.mxu0 %v68_v50 }
  0x55   :  { %418 = vmatmul.mubr.f32.gmra.mxu1 %v70_v51  ;;  %277 = vmatprep.mubr.f32.mxu0 %v73_v52 }
  0x56   :  { %422 = vmatprep.mubr.f32.mxu1 %v75_v53 }
  0x58   :  { %278 = vmatmul.mubr.f32.gmra.mxu0 %v72_v54 }
  0x59   :  { %423 = vmatmul.mubr.f32.gmra.mxu1 %v74_v55  ;;  %282 = vmatprep.mubr.f32.mxu0 %v77_v56 }
  0x5a   :  { %427 = vmatprep.mubr.f32.mxu1 %v79_v57 }
  0x5c   :  { %283 = vmatmul.mubr.f32.gmra.mxu0 %v76_v58 }
  0x5d   :  { %428 = vmatmul.mubr.f32.gmra.mxu1 %v78_v59  ;;  %287 = vmatprep.mubr.f32.mxu0 %v81_v60 }
  0x5e   :  { %432 = vmatprep.mubr.f32.mxu1 %v83_v61 }
  0x60   :  { %288 = vmatmul.mubr.f32.gmra.mxu0 %v80_v62 }
  0x61   :  { %433 = vmatmul.mubr.f32.gmra.mxu1 %v82_v63 }
  0xe4   :  { %v594_v0 = vpop.f32.mrf.mxu0 }
  0xe5   :  { %v674_v1 = vpop.f32.mrf.mxu1 }
  0xe6   :  { %v595_v2 = vpop.f32.mrf.mxu0 }
  0xe7   :  { %v675_v3 = vpop.f32.mrf.mxu1  ;;  %v596_v4 = vadd.f32 %v595_v2, %v594_v0 }
  0xe8   :  { %v676_v5 = vadd.f32 %v675_v3, %v674_v1  ;;  %v597_v7 = vpop.f32.mrf.mxu0 }
  0xe9   :  { %v677_v8 = vpop.f32.mrf.mxu1 }
  0xea   :  { %v360_v9 = vadd.f32 %v676_v5, %v596_v4  ;;  %v598_v11 = vpop.f32.mrf.mxu0 }
  0xeb   :  { %v678_v12 = vpop.f32.mrf.mxu1  ;;  %v599_v14 = vadd.f32 %v598_v11, %v597_v7 }
  0xec   :  { %v445_v13 = vmul.f32 %v1139_v6, %v360_v9  ;;  %v679_v15 = vadd.f32 %v678_v12, %v677_v8  ;;  %v600_v17 = vpop.f32.mrf.mxu0 }
  0xed   :  { %v680_v18 = vpop.f32.mrf.mxu1 }
  0xee   :  { %v468_v19 = vadd.f32 %v1144_v10, %v445_v13  ;;  %v365_v20 = vadd.f32 %v679_v15, %v599_v14  ;;  %v601_v21 = vpop.f32.mrf.mxu0 }
  0xef   :  { %v681_v22 = vpop.f32.mrf.mxu1  ;;  %v602_v25 = vadd.f32 %v601_v21, %v600_v17 }
  0xf0   :  { %vm484_vm0 = vcmp.gt.f32.partialorder %v468_v19, 0.0  ;;  %v507_v23 = vmul.f32 %v1150_v16, %v468_v19  ;;  %v446_v24 = vmul.f32 %v1139_v6, %v365_v20  ;;  %v682_v26 = vadd.f32 %v681_v22, %v680_v18  ;;  %v603_v27 = vpop.f32.mrf.mxu0 }
  0xf1   :  { %v683_v28 = vpop.f32.mrf.mxu1 }
  0xf2   :  { %v523_v29 = vsel %vm484_vm0, %v468_v19, %v507_v23  ;;  %v469_v30 = vadd.f32 %v1144_v10, %v446_v24  ;;  %v370_v31 = vadd.f32 %v682_v26, %v602_v25  ;;  %v604_v32 = vpop.f32.mrf.mxu0 }
  0xf3   :  { %539 = vst [vmem:[%s1252_s5] sm:$0xff] %v523_v29  ;;  %v684_v33 = vpop.f32.mrf.mxu1  ;;  %v605_v35 = vadd.f32 %v604_v32, %v603_v27 }
  0xf4   :  { %vm485_vm1 = vcmp.gt.f32.partialorder %v469_v30, 0.0  ;;  %v508_v34 = vmul.f32 %v1150_v16, %v469_v30  ;;  %v685_v36 = vadd.f32 %v684_v33, %v683_v28  ;;  %v447_v37 = vmul.f32 %v1139_v6, %v370_v31  ;;  %v606_v38 = vpop.f32.mrf.mxu0 }
  0xf5   :  { %v686_v39 = vpop.f32.mrf.mxu1 }
  0xf6   :  { %v524_v40 = vsel %vm485_vm1, %v469_v30, %v508_v34  ;;  %v375_v41 = vadd.f32 %v685_v36, %v605_v35  ;;  %v470_v42 = vadd.f32 %v1144_v10, %v447_v37  ;;  %v607_v43 = vpop.f32.mrf.mxu0 }
  0xf7   :  { %540 = vst [vmem:[%s1252_s5 + $0x8] sm:$0xff] %v524_v40  ;;  %v687_v44 = vpop.f32.mrf.mxu1  ;;  %v608_v46 = vadd.f32 %v607_v43, %v606_v38 }
  0xf8   :  { %v448_v45 = vmul.f32 %v1139_v6, %v375_v41  ;;  %v688_v47 = vadd.f32 %v687_v44, %v686_v39  ;;  %vm486_vm2 = vcmp.gt.f32.partialorder %v470_v42, 0.0  ;;  %v509_v48 = vmul.f32 %v1150_v16, %v470_v42  ;;  %v609_v49 = vpop.f32.mrf.mxu0 }
  0xf9   :  { %v689_v50 = vpop.f32.mrf.mxu1 }
  0xfa   :  { %v471_v51 = vadd.f32 %v1144_v10, %v448_v45  ;;  %v380_v52 = vadd.f32 %v688_v47, %v608_v46  ;;  %v525_v53 = vsel %vm486_vm2, %v470_v42, %v509_v48  ;;  %v610_v54 = vpop.f32.mrf.mxu0 }
  0xfb   :  { %v690_v55 = vpop.f32.mrf.mxu1  ;;  %541 = vst [vmem:[%s1252_s5 + $0x10] sm:$0xff] %v525_v53  ;;  %v611_v58 = vadd.f32 %v610_v54, %v609_v49 }
  0xfc   :  { %vm487_vm3 = vcmp.gt.f32.partialorder %v471_v51, 0.0  ;;  %v510_v56 = vmul.f32 %v1150_v16, %v471_v51  ;;  %v449_v57 = vmul.f32 %v1139_v6, %v380_v52  ;;  %v691_v59 = vadd.f32 %v690_v55, %v689_v50  ;;  %v612_v60 = vpop.f32.mrf.mxu0 }
  0xfd   :  { %v692_v61 = vpop.f32.mrf.mxu1 }
  0xfe   :  { %v526_v62 = vsel %vm487_vm3, %v471_v51, %v510_v56  ;;  %v472_v63 = vadd.f32 %v1144_v10, %v449_v57  ;;  %v385_v0 = vadd.f32 %v691_v59, %v611_v58  ;;  %v613_v1 = vpop.f32.mrf.mxu0 }
  0xff   :  { %542 = vst [vmem:[%s1252_s5 + $0x18] sm:$0xff] %v526_v62  ;;  %v693_v2 = vpop.f32.mrf.mxu1  ;;  %v614_v4 = vadd.f32 %v613_v1, %v612_v60 }
 0x100   :  { %vm488_vm4 = vcmp.gt.f32.partialorder %v472_v63, 0.0  ;;  %v511_v3 = vmul.f32 %v1150_v16, %v472_v63  ;;  %v694_v5 = vadd.f32 %v693_v2, %v692_v61  ;;  %v450_v7 = vmul.f32 %v1139_v6, %v385_v0  ;;  %v615_v8 = vpop.f32.mrf.mxu0 }
 0x101   :  { %v695_v9 = vpop.f32.mrf.mxu1 }
 0x102   :  { %v527_v11 = vsel %vm488_vm4, %v472_v63, %v511_v3  ;;  %v390_v12 = vadd.f32 %v694_v5, %v614_v4  ;;  %v473_v13 = vadd.f32 %v1144_v10, %v450_v7  ;;  %v616_v14 = vpop.f32.mrf.mxu0 }
 0x103   :  { %543 = vst [vmem:[%s1252_s5 + $0x20] sm:$0xff] %v527_v11  ;;  %v696_v15 = vpop.f32.mrf.mxu1  ;;  %v617_v18 = vadd.f32 %v616_v14, %v615_v8 }
 0x104   :  { %v451_v17 = vmul.f32 %v1139_v6, %v390_v12  ;;  %v697_v19 = vadd.f32 %v696_v15, %v695_v9  ;;  %vm489_vm5 = vcmp.gt.f32.partialorder %v473_v13, 0.0  ;;  %v512_v20 = vmul.f32 %v1150_v16, %v473_v13  ;;  %v618_v21 = vpop.f32.mrf.mxu0 }
 0x105   :  { %v698_v22 = vpop.f32.mrf.mxu1 }
 0x106   :  { %v474_v23 = vadd.f32 %v1144_v10, %v451_v17  ;;  %v395_v24 = vadd.f32 %v697_v19, %v617_v18  ;;  %v528_v25 = vsel %vm489_vm5, %v473_v13, %v512_v20  ;;  %v619_v26 = vpop.f32.mrf.mxu0 }
 0x107   :  { %v699_v27 = vpop.f32.mrf.mxu1  ;;  %544 = vst [vmem:[%s1252_s5 + $0x28] sm:$0xff] %v528_v25  ;;  %v620_v30 = vadd.f32 %v619_v26, %v618_v21 }
 0x108   :  { %vm490_vm6 = vcmp.gt.f32.partialorder %v474_v23, 0.0  ;;  %v513_v28 = vmul.f32 %v1150_v16, %v474_v23  ;;  %v452_v29 = vmul.f32 %v1139_v6, %v395_v24  ;;  %v700_v31 = vadd.f32 %v699_v27, %v698_v22  ;;  %v621_v32 = vpop.f32.mrf.mxu0 }
 0x109   :  { %v701_v33 = vpop.f32.mrf.mxu1 }
 0x10a   :  { %v529_v34 = vsel %vm490_vm6, %v474_v23, %v513_v28  ;;  %v475_v35 = vadd.f32 %v1144_v10, %v452_v29  ;;  %v400_v36 = vadd.f32 %v700_v31, %v620_v30  ;;  %v622_v37 = vpop.f32.mrf.mxu0 }
 0x10b   :  { %545 = vst [vmem:[%s1252_s5 + $0x30] sm:$0xff] %v529_v34  ;;  %v702_v38 = vpop.f32.mrf.mxu1  ;;  %v623_v40 = vadd.f32 %v622_v37, %v621_v32 }
 0x10c   :  { %vm491_vm7 = vcmp.gt.f32.partialorder %v475_v35, 0.0  ;;  %v514_v39 = vmul.f32 %v1150_v16, %v475_v35  ;;  %v703_v41 = vadd.f32 %v702_v38, %v701_v33  ;;  %v453_v42 = vmul.f32 %v1139_v6, %v400_v36  ;;  %v624_v43 = vpop.f32.mrf.mxu0 }
 0x10d   :  { %v704_v44 = vpop.f32.mrf.mxu1 }
 0x10e   :  { %v530_v45 = vsel %vm491_vm7, %v475_v35, %v514_v39  ;;  %v405_v46 = vadd.f32 %v703_v41, %v623_v40  ;;  %v476_v47 = vadd.f32 %v1144_v10, %v453_v42  ;;  %v625_v48 = vpop.f32.mrf.mxu0 }
 0x10f   :  { %546 = vst [vmem:[%s1252_s5 + $0x38] sm:$0xff] %v530_v45  ;;  %v705_v49 = vpop.f32.mrf.mxu1  ;;  %v626_v51 = vadd.f32 %v625_v48, %v624_v43 }
 0x110   :  { %v454_v50 = vmul.f32 %v1139_v6, %v405_v46  ;;  %v706_v52 = vadd.f32 %v705_v49, %v704_v44  ;;  %vm492_vm8 = vcmp.gt.f32.partialorder %v476_v47, 0.0  ;;  %v515_v53 = vmul.f32 %v1150_v16, %v476_v47  ;;  %v627_v54 = vpop.f32.mrf.mxu0 }
 0x111   :  { %v707_v55 = vpop.f32.mrf.mxu1 }
 0x112   :  { %v477_v56 = vadd.f32 %v1144_v10, %v454_v50  ;;  %v410_v57 = vadd.f32 %v706_v52, %v626_v51  ;;  %v531_v58 = vsel %vm492_vm8, %v476_v47, %v515_v53  ;;  %v628_v59 = vpop.f32.mrf.mxu0 }
 0x113   :  { %v708_v60 = vpop.f32.mrf.mxu1  ;;  %547 = vst [vmem:[%s1252_s5 + $0x40] sm:$0xff] %v531_v58  ;;  %v629_v63 = vadd.f32 %v628_v59, %v627_v54 }
 0x114   :  { %vm493_vm9 = vcmp.gt.f32.partialorder %v477_v56, 0.0  ;;  %v516_v61 = vmul.f32 %v1150_v16, %v477_v56  ;;  %v455_v62 = vmul.f32 %v1139_v6, %v410_v57  ;;  %v709_v0 = vadd.f32 %v708_v60, %v707_v55  ;;  %v630_v1 = vpop.f32.mrf.mxu0 }
 0x115   :  { %v710_v2 = vpop.f32.mrf.mxu1 }
 0x116   :  { %v532_v3 = vsel %vm493_vm9, %v477_v56, %v516_v61  ;;  %v478_v4 = vadd.f32 %v1144_v10, %v455_v62  ;;  %v415_v5 = vadd.f32 %v709_v0, %v629_v63  ;;  %v631_v7 = vpop.f32.mrf.mxu0 }
 0x117   :  { %548 = vst [vmem:[%s1252_s5 + $0x48] sm:$0xff] %v532_v3  ;;  %v711_v8 = vpop.f32.mrf.mxu1  ;;  %v632_v11 = vadd.f32 %v631_v7, %v630_v1 }
 0x118   :  { %vm494_vm10 = vcmp.gt.f32.partialorder %v478_v4, 0.0  ;;  %v517_v9 = vmul.f32 %v1150_v16, %v478_v4  ;;  %v712_v12 = vadd.f32 %v711_v8, %v710_v2  ;;  %v456_v13 = vmul.f32 %v1139_v6, %v415_v5  ;;  %v633_v14 = vpop.f32.mrf.mxu0 }
 0x119   :  { %v713_v15 = vpop.f32.mrf.mxu1 }
 0x11a   :  { %v533_v17 = vsel %vm494_vm10, %v478_v4, %v517_v9  ;;  %v420_v18 = vadd.f32 %v712_v12, %v632_v11  ;;  %v479_v19 = vadd.f32 %v1144_v10, %v456_v13  ;;  %v634_v20 = vpop.f32.mrf.mxu0 }
 0x11b   :  { %549 = vst [vmem:[%s1252_s5 + $0x50] sm:$0xff] %v533_v17  ;;  %v714_v21 = vpop.f32.mrf.mxu1  ;;  %v635_v23 = vadd.f32 %v634_v20, %v633_v14 }
 0x11c   :  { %v457_v22 = vmul.f32 %v1139_v6, %v420_v18  ;;  %v715_v24 = vadd.f32 %v714_v21, %v713_v15  ;;  %vm495_vm11 = vcmp.gt.f32.partialorder %v479_v19, 0.0  ;;  %v518_v25 = vmul.f32 %v1150_v16, %v479_v19  ;;  %v636_v26 = vpop.f32.mrf.mxu0 }
 0x11d   :  { %v716_v27 = vpop.f32.mrf.mxu1 }
 0x11e   :  { %v480_v28 = vadd.f32 %v1144_v10, %v457_v22  ;;  %v425_v29 = vadd.f32 %v715_v24, %v635_v23  ;;  %v534_v30 = vsel %vm495_vm11, %v479_v19, %v518_v25  ;;  %v637_v31 = vpop.f32.mrf.mxu0 }
 0x11f   :  { %v717_v32 = vpop.f32.mrf.mxu1  ;;  %550 = vst [vmem:[%s1252_s5 + $0x58] sm:$0xff] %v534_v30  ;;  %v638_v35 = vadd.f32 %v637_v31, %v636_v26 }
 0x120   :  { %vm496_vm12 = vcmp.gt.f32.partialorder %v480_v28, 0.0  ;;  %v519_v33 = vmul.f32 %v1150_v16, %v480_v28  ;;  %v458_v34 = vmul.f32 %v1139_v6, %v425_v29  ;;  %v718_v36 = vadd.f32 %v717_v32, %v716_v27  ;;  %v639_v37 = vpop.f32.mrf.mxu0 }
 0x121   :  { %v719_v38 = vpop.f32.mrf.mxu1 }
 0x122   :  { %v535_v39 = vsel %vm496_vm12, %v480_v28, %v519_v33  ;;  %v481_v40 = vadd.f32 %v1144_v10, %v458_v34  ;;  %v430_v41 = vadd.f32 %v718_v36, %v638_v35  ;;  %v640_v42 = vpop.f32.mrf.mxu0 }
 0x123   :  { %551 = vst [vmem:[%s1252_s5 + $0x60] sm:$0xff] %v535_v39  ;;  %v720_v43 = vpop.f32.mrf.mxu1  ;;  %v641_v45 = vadd.f32 %v640_v42, %v639_v37 }
 0x124   :  { %vm497_vm13 = vcmp.gt.f32.partialorder %v481_v40, 0.0  ;;  %v520_v44 = vmul.f32 %v1150_v16, %v481_v40  ;;  %v721_v46 = vadd.f32 %v720_v43, %v719_v38  ;;  %v459_v47 = vmul.f32 %v1139_v6, %v430_v41 }
 0x126   :  { %v536_v48 = vsel %vm497_vm13, %v481_v40, %v520_v44  ;;  %v435_v49 = vadd.f32 %v721_v46, %v641_v45  ;;  %v482_v50 = vadd.f32 %v1144_v10, %v459_v47 }
 0x127   :  { %552 = vst [vmem:[%s1252_s5 + $0x68] sm:$0xff] %v536_v48 }
 0x128   :  { %v460_v51 = vmul.f32 %v1139_v6, %v435_v49  ;;  %vm498_vm14 = vcmp.gt.f32.partialorder %v482_v50, 0.0  ;;  %v521_v52 = vmul.f32 %v1150_v16, %v482_v50 }
 0x12a   :  { %v483_v53 = vadd.f32 %v1144_v10, %v460_v51  ;;  %v537_v54 = vsel %vm498_vm14, %v482_v50, %v521_v52 }
 0x12b   :  { %553 = vst [vmem:[%s1252_s5 + $0x70] sm:$0xff] %v537_v54 }
 0x12c   :  { %vm499_vm15 = vcmp.gt.f32.partialorder %v483_v53, 0.0  ;;  %v522_v55 = vmul.f32 %v1150_v16, %v483_v53 }
 0x12e   :  { %v538_v56 = vsel %vm499_vm15, %v483_v53, %v522_v55 }
 0x12f   :  { %554 = vst [vmem:[%s1252_s5 + $0x78] sm:$0xff] %v538_v56 }

</bundles_post_ra>
